<compile_context>
chip_gen: v7x
topology: tpu7x:2x2x1
jax: 0.10.0
libtpu: 0.0.40
codegen_flags: <defaults>
</compile_context>

<pallas_src>
import functools

import jax
import jax.numpy as jnp
from jax.experimental import pallas as pl
from jax.experimental.pallas import tpu as pltpu

EPS = 1e-3  # BatchNorm2d(eps=0.001) from the module
_VMEM_LIMIT = 48 * 1024 * 1024  # safe on v7x (64 MiB/TC) and v5e/v6e


def _pick_tile_p(hw_pad: int, cap: int = 8192) -> int:
    """Largest multiple of 128 that divides hw_pad (a multiple of 128), <= cap."""
    if hw_pad <= cap:
        return hw_pad
    best = 128
    t = 128
    while t <= cap:
        if hw_pad % t == 0:
            best = t
        t += 128
    return best


# ---- pass 1: conv2d24 (y1 = w1 @ x78) + per-(batch,channel) sum / sumsq ------
def _conv1_stats_kernel(x78_ref, w1_ref, y1_ref, s1_ref, ss1_ref):
    @pl.when(pl.program_id(1) == 0)
    def _():
        s1_ref[...] = jnp.zeros_like(s1_ref)
        ss1_ref[...] = jnp.zeros_like(ss1_ref)

    x = x78_ref[0].astype(jnp.bfloat16)                                # (C_in, TP)
    y1 = jnp.dot(w1_ref[...], x, preferred_element_type=jnp.float32)  # (C_mid, TP)
    y1_ref[0] = y1.astype(y1_ref.dtype)                                # bf16 store
    s1_ref[0] += jnp.sum(y1, axis=1, keepdims=True)
    ss1_ref[0] += jnp.sum(y1 * y1, axis=1, keepdims=True)


# ---- pass 2: BN1 (folded) + residual + conv2d25, statistics only -------------
def _bn1_add_conv2_stats_kernel(y1_ref, x71_ref, scale1_ref, shift1_ref, w2_ref,
                                s2_ref, ss2_ref, *, tile_p, hw, needs_mask):
    @pl.when(pl.program_id(1) == 0)
    def _():
        s2_ref[...] = jnp.zeros_like(s2_ref)
        ss2_ref[...] = jnp.zeros_like(ss2_ref)

    y1 = y1_ref[0].astype(jnp.float32)                                 # (C_mid, TP)
    z = y1 * scale1_ref[...] + shift1_ref[...] + x71_ref[0]
    if needs_mask:
        col = (pl.program_id(1) * tile_p
               + jax.lax.broadcasted_iota(jnp.int32, z.shape, 1))
        z = jnp.where(col < hw, z, 0.0)  # keep padded columns out of the stats
    y2 = jnp.dot(w2_ref[...], z.astype(jnp.bfloat16),
                 preferred_element_type=jnp.float32)                   # (C_in, TP)
    s2_ref[0] += jnp.sum(y2, axis=1, keepdims=True)
    ss2_ref[0] += jnp.sum(y2 * y2, axis=1, keepdims=True)


# ---- pass 3: recompute z and y2, apply BN2, write the final output -----------
def _recompute_bn2_kernel(y1_ref, x71_ref, scale1_ref, shift1_ref, w2_ref,
                          scale2_ref, shift2_ref, out_ref):
    y1 = y1_ref[0].astype(jnp.float32)
    z = y1 * scale1_ref[...] + shift1_ref[...] + x71_ref[0]
    y2 = jnp.dot(w2_ref[...], z.astype(jnp.bfloat16),
                 preferred_element_type=jnp.float32)
    out_ref[0] = y2 * scale2_ref[...] + shift2_ref[...]


@functools.partial(jax.jit, static_argnames=("tile_p",))
def fused_forward(x78_nchw, x71_nchw, w1, g1, b1, w2, g2, b2, *, tile_p=None):
    """x78_nchw: (N,192,H,W), x71_nchw: (N,32,H,W) -> (N,192,H,W)."""
    N, C_in, H, W = x78_nchw.shape
    C_mid = x71_nchw.shape[1]
    HW = H * W
    HW_pad = ((HW + 127) // 128) * 128
    TP = _pick_tile_p(HW_pad) if tile_p is None else tile_p
    assert HW_pad % TP == 0 and TP % 128 == 0, (HW, HW_pad, TP)
    n_pt = HW_pad // TP
    needs_mask = HW_pad != HW
    grid = (N, n_pt)
    count = N * HW            # per-channel element count for batch statistics
    count_pad = N * HW_pad

    # Free reshapes (plus a zero-pad copy only when HW is not lane-aligned).
    x78 = x78_nchw.reshape(N, C_in, HW)
    x71 = x71_nchw.reshape(N, C_mid, HW)
    if needs_mask:
        pad = HW_pad - HW
        x78 = jnp.pad(x78, ((0, 0), (0, 0), (0, pad)))
        x71 = jnp.pad(x71, ((0, 0), (0, 0), (0, pad)))
    w1m = w1.reshape(C_mid, C_in).astype(jnp.bfloat16)   # conv2d24 weight
    w2m = w2.reshape(C_in, C_mid).astype(jnp.bfloat16)   # conv2d25 weight

    big_spec = pl.BlockSpec((1, C_in, TP), lambda n, p: (n, 0, p))
    mid_spec = pl.BlockSpec((1, C_mid, TP), lambda n, p: (n, 0, p))
    acc_big = pl.BlockSpec((1, C_in, 1), lambda n, p: (n, 0, 0))
    acc_mid = pl.BlockSpec((1, C_mid, 1), lambda n, p: (n, 0, 0))

    def resident(shape):  # whole array, fetched once, VMEM-resident across grid
        return pl.BlockSpec(shape, lambda n, p: (0,) * len(shape))

    stat_params = pltpu.CompilerParams(
        dimension_semantics=("parallel", "arbitrary"),  # per-n accumulator slots
        vmem_limit_bytes=_VMEM_LIMIT)
    par_params = pltpu.CompilerParams(
        dimension_semantics=("parallel", "parallel"),
        vmem_limit_bytes=_VMEM_LIMIT)

    # ---- pass 1: conv2d24 + batch statistics of its output -------------------
    y1, s1, ss1 = pl.pallas_call(
        _conv1_stats_kernel,
        grid=grid,
        in_specs=[big_spec, resident((C_mid, C_in))],
        out_specs=[mid_spec, acc_mid, acc_mid],
        out_shape=[jax.ShapeDtypeStruct((N, C_mid, HW_pad), jnp.bfloat16),
                   jax.ShapeDtypeStruct((N, C_mid, 1), jnp.float32),
                   jax.ShapeDtypeStruct((N, C_mid, 1), jnp.float32)],
        compiler_params=stat_params,
        cost_estimate=pl.CostEstimate(
            flops=2 * count_pad * C_in * C_mid + 4 * count_pad * C_mid,
            transcendentals=0,
            bytes_accessed=4 * count_pad * C_in + 2 * count_pad * C_mid
            + 2 * C_in * C_mid),
    )(x78, w1m)

    mean1 = jnp.sum(s1[:, :, 0], axis=0) / count
    var1 = jnp.maximum(jnp.sum(ss1[:, :, 0], axis=0) / count - mean1 * mean1, 0.0)
    inv1 = g1 * jax.lax.rsqrt(var1 + EPS)
    scale1 = inv1.reshape(C_mid, 1)
    shift1 = (b1 - inv1 * mean1).reshape(C_mid, 1)

    # ---- pass 2: BN1 (folded) + residual + conv2d25, stats only --------------
    kernel2 = functools.partial(_bn1_add_conv2_stats_kernel,
                                tile_p=TP, hw=HW, needs_mask=needs_mask)
    s2, ss2 = pl.pallas_call(
        kernel2,
        grid=grid,
        in_specs=[mid_spec, mid_spec, resident((C_mid, 1)), resident((C_mid, 1)),
                  resident((C_in, C_mid))],
        out_specs=[acc_big, acc_big],
        out_shape=[jax.ShapeDtypeStruct((N, C_in, 1), jnp.float32),
                   jax.ShapeDtypeStruct((N, C_in, 1), jnp.float32)],
        compiler_params=stat_params,
        cost_estimate=pl.CostEstimate(
            flops=2 * count_pad * C_in * C_mid + 4 * count_pad * C_mid
            + 4 * count_pad * C_in,
            transcendentals=0,
            bytes_accessed=2 * count_pad * C_mid + 4 * count_pad * C_mid
            + 2 * C_in * C_mid),
    )(y1, x71, scale1, shift1, w2m)

    mean2 = jnp.sum(s2[:, :, 0], axis=0) / count
    var2 = jnp.maximum(jnp.sum(ss2[:, :, 0], axis=0) / count - mean2 * mean2, 0.0)
    inv2 = g2 * jax.lax.rsqrt(var2 + EPS)
    scale2 = inv2.reshape(C_in, 1)
    shift2 = (b2 - inv2 * mean2).reshape(C_in, 1)

    # ---- pass 3: recompute z, y2 and apply BN2 (fully parallel) --------------
    out = pl.pallas_call(
        _recompute_bn2_kernel,
        grid=grid,
        in_specs=[mid_spec, mid_spec, resident((C_mid, 1)), resident((C_mid, 1)),
                  resident((C_in, C_mid)), resident((C_in, 1)), resident((C_in, 1))],
        out_specs=big_spec,
        out_shape=jax.ShapeDtypeStruct((N, C_in, HW_pad), jnp.float32),
        compiler_params=par_params,
        cost_estimate=pl.CostEstimate(
            flops=2 * count_pad * C_in * C_mid + 3 * count_pad * C_mid
            + 2 * count_pad * C_in,
            transcendentals=0,
            bytes_accessed=2 * count_pad * C_mid + 4 * count_pad * C_mid
            + 4 * count_pad * C_in + 2 * C_in * C_mid),
    )(y1, x71, scale1, shift1, w2m, scale2, shift2)

    if needs_mask:
        out = out[:, :, :HW]
    return out.reshape(N, C_in, H, W)


def _reference(x78, x71, w1, g1, b1, w2, g2, b2):
    """Pure-JAX reference mirroring the kernel numerics (bf16 matmul operands,
    bf16-stored y1, f32 BN statistics)."""
    N, C_in, H, W = x78.shape
    C_mid = x71.shape[1]
    HW = H * W
    w1m = w1.reshape(C_mid, C_in).astype(jnp.bfloat16)
    w2m = w2.reshape(C_in, C_mid).astype(jnp.bfloat16)
    x = x78.reshape(N, C_in, HW).astype(jnp.bfloat16)
    y1 = jnp.einsum("oc,ncp->nop", w1m, x, preferred_element_type=jnp.float32)
    m1 = jnp.mean(y1, axis=(0, 2))
    v1 = jnp.mean(jnp.square(y1), axis=(0, 2)) - m1 * m1
    inv1 = g1 * jax.lax.rsqrt(v1 + EPS)
    y1b = y1.astype(jnp.bfloat16).astype(jnp.float32)   # mirrors bf16 y1 storage
    z = y1b * inv1[None, :, None] + (b1 - inv1 * m1)[None, :, None] \
        + x71.reshape(N, C_mid, HW)
    y2 = jnp.einsum("oc,ncp->nop", w2m, z.astype(jnp.bfloat16),
                    preferred_element_type=jnp.float32)
    m2 = jnp.mean(y2, axis=(0, 2))
    v2 = jnp.mean(jnp.square(y2), axis=(0, 2)) - m2 * m2
    inv2 = g2 * jax.lax.rsqrt(v2 + EPS)
    out = y2 * inv2[None, :, None] + (b2 - inv2 * m2)[None, :, None]
    return out.reshape(N, C_in, H, W)


if __name__ == "__main__":
    # Channels fixed by the module (192 / 32); spatial 28x28 matches the spec
    # (H*W = 784, not a multiple of 128 -> exercises the padding/masking path).
    N, H, W = 2, 28, 28
    C_in, C_mid = 192, 32

    key = jax.random.PRNGKey(0)
    ks = jax.random.split(key, 8)
    x78 = jax.random.normal(ks[0], (N, C_in, H, W), dtype=jnp.float32)
    x71 = jax.random.normal(ks[1], (N, C_mid, H, W), dtype=jnp.float32)
    # torch conv weights: (32,192,1,1) and (192,32,1,1)
    w1 = 0.1 * jax.random.normal(ks[2], (C_mid, C_in, 1, 1), dtype=jnp.float32)
    w2 = 0.1 * jax.random.normal(ks[3], (C_in, C_mid, 1, 1), dtype=jnp.float32)
    g1 = 1.0 + 0.05 * jax.random.normal(ks[4], (C_mid,), dtype=jnp.float32)
    b1 = 0.05 * jax.random.normal(ks[5], (C_mid,), dtype=jnp.float32)
    g2 = 1.0 + 0.05 * jax.random.normal(ks[6], (C_in,), dtype=jnp.float32)
    b2 = 0.05 * jax.random.normal(ks[7], (C_in,), dtype=jnp.float32)

    # tile_p=128 -> grid (N=2, 896/128=7): exercises spatial padding (784->896),
    # multi-tile stat accumulation, per-batch accumulator slots and lane masking.
    out = fused_forward(x78, x71, w1, g1, b1, w2, g2, b2, tile_p=128)
    jax.block_until_ready(out)
    assert out.shape == (N, C_in, H, W)

    ref = _reference(x78, x71, w1, g1, b1, w2, g2, b2)
    max_err = float(jnp.max(jnp.abs(out - ref)))
    assert max_err < 5e-3, f"max abs err vs reference: {max_err}"
    print("KERNEL_OK")
</pallas_src>

<mosaic_0001>
module attributes {stable_mosaic.version = 11 : i64} {
  func.func @_conv1_stats_kernel(%arg0: i32, %arg1: i32, %arg2: memref<1x192x128xf32, #tpu.memory_space<vmem>>, %arg3: memref<32x192xbf16, #tpu.memory_space<vmem>>, %arg4: memref<1x32x128xbf16, #tpu.memory_space<vmem>>, %arg5: memref<1x32x1xf32, #tpu.memory_space<vmem>>, %arg6: memref<1x32x1xf32, #tpu.memory_space<vmem>>) attributes {dimension_semantics = [#tpu.dimension_semantics<parallel>, #tpu.dimension_semantics<arbitrary>], iteration_bounds = array<i64: 2, 7>, scalar_prefetch = 0 : i64, scratch_operands = 0 : i64, tpu.core_type = #tpu.core_type<tc>, window_params = [{transform_indices = @transform_0, window_bounds = array<i64: 1, 192, 128>}, {pipeline_mode = #tpu.pipeline_mode<synchronous>, transform_indices = @transform_1, window_bounds = array<i64: 32, 192>}, {transform_indices = @transform_2, window_bounds = array<i64: 1, 32, 128>}, {transform_indices = @transform_3, window_bounds = array<i64: 1, 32, 1>}, {transform_indices = @transform_4, window_bounds = array<i64: 1, 32, 1>}]} {
    %c0_i32 = arith.constant 0 : i32
    %0 = arith.cmpi eq, %arg1, %c0_i32 : i32
    %1 = arith.extui %0 : i1 to i32
    %c0_i32_0 = arith.constant 0 : i32
    %2 = arith.cmpi ne, %1, %c0_i32_0 : i32
    scf.if %2 {
      %cst_22 = arith.constant 0.000000e+00 : f32
      %29 = vector.broadcast %cst_22 : f32 to vector<1x32x1xf32>
      %c0_23 = arith.constant 0 : index
      %c0_24 = arith.constant 0 : index
      %c0_25 = arith.constant 0 : index
      %30 = vector.load %arg5[%c0_23, %c0_24, %c0_25] : memref<1x32x1xf32, #tpu.memory_space<vmem>>, vector<1x32x1xf32>
      tpu.vector_store %arg5[%c0_23, %c0_24, %c0_25], %29 {strides = array<i32>} : memref<1x32x1xf32, #tpu.memory_space<vmem>>, vector<1x32x1xf32>,
      %cst_26 = arith.constant 0.000000e+00 : f32
      %31 = vector.broadcast %cst_26 : f32 to vector<1x32x1xf32>
      %c0_27 = arith.constant 0 : index
      %c0_28 = arith.constant 0 : index
      %c0_29 = arith.constant 0 : index
      %32 = vector.load %arg6[%c0_27, %c0_28, %c0_29] : memref<1x32x1xf32, #tpu.memory_space<vmem>>, vector<1x32x1xf32>
      tpu.vector_store %arg6[%c0_27, %c0_28, %c0_29], %31 {strides = array<i32>} : memref<1x32x1xf32, #tpu.memory_space<vmem>>, vector<1x32x1xf32>,
    } else {
    }
    %c0 = arith.constant 0 : index
    %c0_1 = arith.constant 0 : index
    %c0_2 = arith.constant 0 : index
    %3 = vector.load %arg2[%c0, %c0_1, %c0_2] : memref<1x192x128xf32, #tpu.memory_space<vmem>>, vector<1x192x128xf32>
    %4 = vector.shape_cast %3 : vector<1x192x128xf32> to vector<192x128xf32>
    %5 = arith.truncf %4 : vector<192x128xf32> to vector<192x128xbf16>
    %c0_3 = arith.constant 0 : index
    %c0_4 = arith.constant 0 : index
    %6 = vector.load %arg3[%c0_3, %c0_4] : memref<32x192xbf16, #tpu.memory_space<vmem>>, vector<32x192xbf16>
    %cst = arith.constant dense<0.000000e+00> : vector<32x128xf32>
    %7 = tpu.matmul %6, %5, %cst {dimension_numbers = #tpu.dot_dimension_numbers<[1], [0], [0], [1], [0, 0, 1, 1], [], []>} : vector<32x192xbf16>, vector<192x128xbf16>, vector<32x128xf32> -> vector<32x128xf32>
    %8 = arith.truncf %7 : vector<32x128xf32> to vector<32x128xbf16>
    %c0_5 = arith.constant 0 : index
    %c0_6 = arith.constant 0 : index
    %c0_7 = arith.constant 0 : index
    %9 = vector.load %arg4[%c0_5, %c0_6, %c0_7] : memref<1x32x128xbf16, #tpu.memory_space<vmem>>, vector<1x32x128xbf16>
    %10 = vector.shape_cast %9 : vector<1x32x128xbf16> to vector<32x128xbf16>
    %11 = vector.shape_cast %8 : vector<32x128xbf16> to vector<1x32x128xbf16>
    tpu.vector_store %arg4[%c0_5, %c0_6, %c0_7], %11 {strides = array<i32>} : memref<1x32x128xbf16, #tpu.memory_space<vmem>>, vector<1x32x128xbf16>,
    %c0_8 = arith.constant 0 : index
    %c0_9 = arith.constant 0 : index
    %c0_10 = arith.constant 0 : index
    %12 = vector.load %arg5[%c0_8, %c0_9, %c0_10] : memref<1x32x1xf32, #tpu.memory_space<vmem>>, vector<1x32x1xf32>
    %13 = vector.shape_cast %12 : vector<1x32x1xf32> to vector<32x1xf32>
    %cst_11 = arith.constant dense<0.000000e+00> : vector<32xf32>
    %14 = vector.multi_reduction <add>, %7, %cst_11 [1] : vector<32x128xf32> to vector<32xf32>
    %15 = vector.shape_cast %14 : vector<32xf32> to vector<32x1xf32>
    %16 = arith.addf %13, %15 : vector<32x1xf32>
    %c0_12 = arith.constant 0 : index
    %c0_13 = arith.constant 0 : index
    %c0_14 = arith.constant 0 : index
    %17 = vector.load %arg5[%c0_12, %c0_13, %c0_14] : memref<1x32x1xf32, #tpu.memory_space<vmem>>, vector<1x32x1xf32>
    %18 = vector.shape_cast %17 : vector<1x32x1xf32> to vector<32x1xf32>
    %19 = vector.shape_cast %16 : vector<32x1xf32> to vector<1x32x1xf32>
    tpu.vector_store %arg5[%c0_12, %c0_13, %c0_14], %19 {strides = array<i32>} : memref<1x32x1xf32, #tpu.memory_space<vmem>>, vector<1x32x1xf32>,
    %c0_15 = arith.constant 0 : index
    %c0_16 = arith.constant 0 : index
    %c0_17 = arith.constant 0 : index
    %20 = vector.load %arg6[%c0_15, %c0_16, %c0_17] : memref<1x32x1xf32, #tpu.memory_space<vmem>>, vector<1x32x1xf32>
    %21 = vector.shape_cast %20 : vector<1x32x1xf32> to vector<32x1xf32>
    %22 = arith.mulf %7, %7 : vector<32x128xf32>
    %cst_18 = arith.constant dense<0.000000e+00> : vector<32xf32>
    %23 = vector.multi_reduction <add>, %22, %cst_18 [1] : vector<32x128xf32> to vector<32xf32>
    %24 = vector.shape_cast %23 : vector<32xf32> to vector<32x1xf32>
    %25 = arith.addf %21, %24 : vector<32x1xf32>
    %c0_19 = arith.constant 0 : index
    %c0_20 = arith.constant 0 : index
    %c0_21 = arith.constant 0 : index
    %26 = vector.load %arg6[%c0_19, %c0_20, %c0_21] : memref<1x32x1xf32, #tpu.memory_space<vmem>>, vector<1x32x1xf32>
    %27 = vector.shape_cast %26 : vector<1x32x1xf32> to vector<32x1xf32>
    %28 = vector.shape_cast %25 : vector<32x1xf32> to vector<1x32x1xf32>
    tpu.vector_store %arg6[%c0_19, %c0_20, %c0_21], %28 {strides = array<i32>} : memref<1x32x1xf32, #tpu.memory_space<vmem>>, vector<1x32x1xf32>,
    return
  }
  func.func @transform_0(%arg0: i32, %arg1: i32) -> (i32, i32, i32) {
    %c0_i32 = arith.constant 0 : i32
    %c0_i32_0 = arith.constant 0 : i32
    return %arg0, %c0_i32, %arg1 : i32, i32, i32
  }
  func.func @transform_1(%arg0: i32, %arg1: i32) -> (i32, i32) {
    %c0_i32 = arith.constant 0 : i32
    %c0_i32_0 = arith.constant 0 : i32
    %c0_i32_1 = arith.constant 0 : i32
    return %c0_i32, %c0_i32_0 : i32, i32
  }
  func.func @transform_2(%arg0: i32, %arg1: i32) -> (i32, i32, i32) {
    %c0_i32 = arith.constant 0 : i32
    %c0_i32_0 = arith.constant 0 : i32
    return %arg0, %c0_i32, %arg1 : i32, i32, i32
  }
  func.func @transform_3(%arg0: i32, %arg1: i32) -> (i32, i32, i32) {
    %c0_i32 = arith.constant 0 : i32
    %c0_i32_0 = arith.constant 0 : i32
    %c0_i32_1 = arith.constant 0 : i32
    return %arg0, %c0_i32, %c0_i32_0 : i32, i32, i32
  }
  func.func @transform_4(%arg0: i32, %arg1: i32) -> (i32, i32, i32) {
    %c0_i32 = arith.constant 0 : i32
    %c0_i32_0 = arith.constant 0 : i32
    %c0_i32_1 = arith.constant 0 : i32
    return %arg0, %c0_i32, %c0_i32_0 : i32, i32, i32
  }
}

module attributes {stable_mosaic.version = 11 : i64} {
  func.func @_bn1_add_conv2_stats_kernel(%arg0: i32, %arg1: i32, %arg2: memref<1x32x128xbf16, #tpu.memory_space<vmem>>, %arg3: memref<1x32x128xf32, #tpu.memory_space<vmem>>, %arg4: memref<32x1xf32, #tpu.memory_space<vmem>>, %arg5: memref<32x1xf32, #tpu.memory_space<vmem>>, %arg6: memref<192x32xbf16, #tpu.memory_space<vmem>>, %arg7: memref<1x192x1xf32, #tpu.memory_space<vmem>>, %arg8: memref<1x192x1xf32, #tpu.memory_space<vmem>>) attributes {dimension_semantics = [#tpu.dimension_semantics<parallel>, #tpu.dimension_semantics<arbitrary>], iteration_bounds = array<i64: 2, 7>, scalar_prefetch = 0 : i64, scratch_operands = 0 : i64, tpu.core_type = #tpu.core_type<tc>, window_params = [{transform_indices = @transform_0, window_bounds = array<i64: 1, 32, 128>}, {transform_indices = @transform_1, window_bounds = array<i64: 1, 32, 128>}, {pipeline_mode = #tpu.pipeline_mode<synchronous>, transform_indices = @transform_2, window_bounds = array<i64: 32, 1>}, {pipeline_mode = #tpu.pipeline_mode<synchronous>, transform_indices = @transform_3, window_bounds = array<i64: 32, 1>}, {pipeline_mode = #tpu.pipeline_mode<synchronous>, transform_indices = @transform_4, window_bounds = array<i64: 192, 32>}, {transform_indices = @transform_5, window_bounds = array<i64: 1, 192, 1>}, {transform_indices = @transform_6, window_bounds = array<i64: 1, 192, 1>}]} {
    %c0_i32 = arith.constant 0 : i32
    %0 = arith.cmpi eq, %arg1, %c0_i32 : i32
    %1 = arith.extui %0 : i1 to i32
    %c0_i32_0 = arith.constant 0 : i32
    %2 = arith.cmpi ne, %1, %c0_i32_0 : i32
    scf.if %2 {
      %cst_27 = arith.constant 0.000000e+00 : f32
      %43 = vector.broadcast %cst_27 : f32 to vector<1x192x1xf32>
      %c0_28 = arith.constant 0 : index
      %c0_29 = arith.constant 0 : index
      %c0_30 = arith.constant 0 : index
      %44 = vector.load %arg7[%c0_28, %c0_29, %c0_30] : memref<1x192x1xf32, #tpu.memory_space<vmem>>, vector<1x192x1xf32>
      tpu.vector_store %arg7[%c0_28, %c0_29, %c0_30], %43 {strides = array<i32>} : memref<1x192x1xf32, #tpu.memory_space<vmem>>, vector<1x192x1xf32>,
      %cst_31 = arith.constant 0.000000e+00 : f32
      %45 = vector.broadcast %cst_31 : f32 to vector<1x192x1xf32>
      %c0_32 = arith.constant 0 : index
      %c0_33 = arith.constant 0 : index
      %c0_34 = arith.constant 0 : index
      %46 = vector.load %arg8[%c0_32, %c0_33, %c0_34] : memref<1x192x1xf32, #tpu.memory_space<vmem>>, vector<1x192x1xf32>
      tpu.vector_store %arg8[%c0_32, %c0_33, %c0_34], %45 {strides = array<i32>} : memref<1x192x1xf32, #tpu.memory_space<vmem>>, vector<1x192x1xf32>,
    } else {
    }
    %c0 = arith.constant 0 : index
    %c0_1 = arith.constant 0 : index
    %c0_2 = arith.constant 0 : index
    %3 = vector.load %arg2[%c0, %c0_1, %c0_2] : memref<1x32x128xbf16, #tpu.memory_space<vmem>>, vector<1x32x128xbf16>
    %4 = vector.shape_cast %3 : vector<1x32x128xbf16> to vector<32x128xbf16>
    %5 = arith.extf %4 : vector<32x128xbf16> to vector<32x128xf32>
    %c0_3 = arith.constant 0 : index
    %c0_4 = arith.constant 0 : index
    %6 = vector.load %arg4[%c0_3, %c0_4] : memref<32x1xf32, #tpu.memory_space<vmem>>, vector<32x1xf32>
    %7 = vector.broadcast %6 : vector<32x1xf32> to vector<32x128xf32>
    %8 = arith.mulf %5, %7 : vector<32x128xf32>
    %c0_5 = arith.constant 0 : index
    %c0_6 = arith.constant 0 : index
    %9 = vector.load %arg5[%c0_5, %c0_6] : memref<32x1xf32, #tpu.memory_space<vmem>>, vector<32x1xf32>
    %10 = vector.broadcast %9 : vector<32x1xf32> to vector<32x128xf32>
    %11 = arith.addf %8, %10 : vector<32x128xf32>
    %c0_7 = arith.constant 0 : index
    %c0_8 = arith.constant 0 : index
    %c0_9 = arith.constant 0 : index
    %12 = vector.load %arg3[%c0_7, %c0_8, %c0_9] : memref<1x32x128xf32, #tpu.memory_space<vmem>>, vector<1x32x128xf32>
    %13 = vector.shape_cast %12 : vector<1x32x128xf32> to vector<32x128xf32>
    %14 = arith.addf %11, %13 : vector<32x128xf32>
    %c128_i32 = arith.constant 128 : i32
    %15 = arith.muli %arg1, %c128_i32 : i32
    %16 = tpu.iota {dimensions = array<i32: 1>} : vector<32x128xi32>
    %17 = vector.broadcast %15 : i32 to vector<32x128xi32>
    %18 = arith.addi %17, %16 : vector<32x128xi32>
    %c784_i32 = arith.constant 784 : i32
    %19 = vector.broadcast %c784_i32 : i32 to vector<32x128xi32>
    %20 = arith.cmpi slt, %18, %19 : vector<32x128xi32>
    %cst = arith.constant 0.000000e+00 : f32
    %21 = vector.broadcast %cst : f32 to vector<32x128xf32>
    %22 = arith.select %20, %14, %21 : vector<32x128xi1>, vector<32x128xf32>
    %c0_10 = arith.constant 0 : index
    %c0_11 = arith.constant 0 : index
    %23 = vector.load %arg6[%c0_10, %c0_11] : memref<192x32xbf16, #tpu.memory_space<vmem>>, vector<192x32xbf16>
    %24 = arith.truncf %22 : vector<32x128xf32> to vector<32x128xbf16>
    %cst_12 = arith.constant dense<0.000000e+00> : vector<192x128xf32>
    %25 = tpu.matmul %23, %24, %cst_12 {dimension_numbers = #tpu.dot_dimension_numbers<[1], [0], [0], [1], [0, 0, 1, 1], [], []>} : vector<192x32xbf16>, vector<32x128xbf16>, vector<192x128xf32> -> vector<192x128xf32>
    %c0_13 = arith.constant 0 : index
    %c0_14 = arith.constant 0 : index
    %c0_15 = arith.constant 0 : index
    %26 = vector.load %arg7[%c0_13, %c0_14, %c0_15] : memref<1x192x1xf32, #tpu.memory_space<vmem>>, vector<1x192x1xf32>
    %27 = vector.shape_cast %26 : vector<1x192x1xf32> to vector<192x1xf32>
    %cst_16 = arith.constant dense<0.000000e+00> : vector<192xf32>
    %28 = vector.multi_reduction <add>, %25, %cst_16 [1] : vector<192x128xf32> to vector<192xf32>
    %29 = vector.shape_cast %28 : vector<192xf32> to vector<192x1xf32>
    %30 = arith.addf %27, %29 : vector<192x1xf32>
    %c0_17 = arith.constant 0 : index
    %c0_18 = arith.constant 0 : index
    %c0_19 = arith.constant 0 : index
    %31 = vector.load %arg7[%c0_17, %c0_18, %c0_19] : memref<1x192x1xf32, #tpu.memory_space<vmem>>, vector<1x192x1xf32>
    %32 = vector.shape_cast %31 : vector<1x192x1xf32> to vector<192x1xf32>
    %33 = vector.shape_cast %30 : vector<192x1xf32> to vector<1x192x1xf32>
    tpu.vector_store %arg7[%c0_17, %c0_18, %c0_19], %33 {strides = array<i32>} : memref<1x192x1xf32, #tpu.memory_space<vmem>>, vector<1x192x1xf32>,
    %c0_20 = arith.constant 0 : index
    %c0_21 = arith.constant 0 : index
    %c0_22 = arith.constant 0 : index
    %34 = vector.load %arg8[%c0_20, %c0_21, %c0_22] : memref<1x192x1xf32, #tpu.memory_space<vmem>>, vector<1x192x1xf32>
    %35 = vector.shape_cast %34 : vector<1x192x1xf32> to vector<192x1xf32>
    %36 = arith.mulf %25, %25 : vector<192x128xf32>
    %cst_23 = arith.constant dense<0.000000e+00> : vector<192xf32>
    %37 = vector.multi_reduction <add>, %36, %cst_23 [1] : vector<192x128xf32> to vector<192xf32>
    %38 = vector.shape_cast %37 : vector<192xf32> to vector<192x1xf32>
    %39 = arith.addf %35, %38 : vector<192x1xf32>
    %c0_24 = arith.constant 0 : index
    %c0_25 = arith.constant 0 : index
    %c0_26 = arith.constant 0 : index
    %40 = vector.load %arg8[%c0_24, %c0_25, %c0_26] : memref<1x192x1xf32, #tpu.memory_space<vmem>>, vector<1x192x1xf32>
    %41 = vector.shape_cast %40 : vector<1x192x1xf32> to vector<192x1xf32>
    %42 = vector.shape_cast %39 : vector<192x1xf32> to vector<1x192x1xf32>
    tpu.vector_store %arg8[%c0_24, %c0_25, %c0_26], %42 {strides = array<i32>} : memref<1x192x1xf32, #tpu.memory_space<vmem>>, vector<1x192x1xf32>,
    return
  }
  func.func @transform_0(%arg0: i32, %arg1: i32) -> (i32, i32, i32) {
    %c0_i32 = arith.constant 0 : i32
    %c0_i32_0 = arith.constant 0 : i32
    return %arg0, %c0_i32, %arg1 : i32, i32, i32
  }
  func.func @transform_1(%arg0: i32, %arg1: i32) -> (i32, i32, i32) {
    %c0_i32 = arith.constant 0 : i32
    %c0_i32_0 = arith.constant 0 : i32
    return %arg0, %c0_i32, %arg1 : i32, i32, i32
  }
  func.func @transform_2(%arg0: i32, %arg1: i32) -> (i32, i32) {
    %c0_i32 = arith.constant 0 : i32
    %c0_i32_0 = arith.constant 0 : i32
    %c0_i32_1 = arith.constant 0 : i32
    return %c0_i32, %c0_i32_0 : i32, i32
  }
  func.func @transform_3(%arg0: i32, %arg1: i32) -> (i32, i32) {
    %c0_i32 = arith.constant 0 : i32
    %c0_i32_0 = arith.constant 0 : i32
    %c0_i32_1 = arith.constant 0 : i32
    return %c0_i32, %c0_i32_0 : i32, i32
  }
  func.func @transform_4(%arg0: i32, %arg1: i32) -> (i32, i32) {
    %c0_i32 = arith.constant 0 : i32
    %c0_i32_0 = arith.constant 0 : i32
    %c0_i32_1 = arith.constant 0 : i32
    return %c0_i32, %c0_i32_0 : i32, i32
  }
  func.func @transform_5(%arg0: i32, %arg1: i32) -> (i32, i32, i32) {
    %c0_i32 = arith.constant 0 : i32
    %c0_i32_0 = arith.constant 0 : i32
    %c0_i32_1 = arith.constant 0 : i32
    return %arg0, %c0_i32, %c0_i32_0 : i32, i32, i32
  }
  func.func @transform_6(%arg0: i32, %arg1: i32) -> (i32, i32, i32) {
    %c0_i32 = arith.constant 0 : i32
    %c0_i32_0 = arith.constant 0 : i32
    %c0_i32_1 = arith.constant 0 : i32
    return %arg0, %c0_i32, %c0_i32_0 : i32, i32, i32
  }
}

module attributes {stable_mosaic.version = 11 : i64} {
  func.func @_recompute_bn2_kernel(%arg0: i32, %arg1: i32, %arg2: memref<1x32x128xbf16, #tpu.memory_space<vmem>>, %arg3: memref<1x32x128xf32, #tpu.memory_space<vmem>>, %arg4: memref<32x1xf32, #tpu.memory_space<vmem>>, %arg5: memref<32x1xf32, #tpu.memory_space<vmem>>, %arg6: memref<192x32xbf16, #tpu.memory_space<vmem>>, %arg7: memref<192x1xf32, #tpu.memory_space<vmem>>, %arg8: memref<192x1xf32, #tpu.memory_space<vmem>>, %arg9: memref<1x192x128xf32, #tpu.memory_space<vmem>>) attributes {dimension_semantics = [#tpu.dimension_semantics<parallel>, #tpu.dimension_semantics<parallel>], iteration_bounds = array<i64: 2, 7>, scalar_prefetch = 0 : i64, scratch_operands = 0 : i64, tpu.core_type = #tpu.core_type<tc>, window_params = [{transform_indices = @transform_0, window_bounds = array<i64: 1, 32, 128>}, {transform_indices = @transform_1, window_bounds = array<i64: 1, 32, 128>}, {pipeline_mode = #tpu.pipeline_mode<synchronous>, transform_indices = @transform_2, window_bounds = array<i64: 32, 1>}, {pipeline_mode = #tpu.pipeline_mode<synchronous>, transform_indices = @transform_3, window_bounds = array<i64: 32, 1>}, {pipeline_mode = #tpu.pipeline_mode<synchronous>, transform_indices = @transform_4, window_bounds = array<i64: 192, 32>}, {pipeline_mode = #tpu.pipeline_mode<synchronous>, transform_indices = @transform_5, window_bounds = array<i64: 192, 1>}, {pipeline_mode = #tpu.pipeline_mode<synchronous>, transform_indices = @transform_6, window_bounds = array<i64: 192, 1>}, {transform_indices = @transform_7, window_bounds = array<i64: 1, 192, 128>}]} {
    %c0 = arith.constant 0 : index
    %c0_0 = arith.constant 0 : index
    %c0_1 = arith.constant 0 : index
    %0 = vector.load %arg2[%c0, %c0_0, %c0_1] : memref<1x32x128xbf16, #tpu.memory_space<vmem>>, vector<1x32x128xbf16>
    %1 = vector.shape_cast %0 : vector<1x32x128xbf16> to vector<32x128xbf16>
    %2 = arith.extf %1 : vector<32x128xbf16> to vector<32x128xf32>
    %c0_2 = arith.constant 0 : index
    %c0_3 = arith.constant 0 : index
    %3 = vector.load %arg4[%c0_2, %c0_3] : memref<32x1xf32, #tpu.memory_space<vmem>>, vector<32x1xf32>
    %4 = vector.broadcast %3 : vector<32x1xf32> to vector<32x128xf32>
    %5 = arith.mulf %2, %4 : vector<32x128xf32>
    %c0_4 = arith.constant 0 : index
    %c0_5 = arith.constant 0 : index
    %6 = vector.load %arg5[%c0_4, %c0_5] : memref<32x1xf32, #tpu.memory_space<vmem>>, vector<32x1xf32>
    %7 = vector.broadcast %6 : vector<32x1xf32> to vector<32x128xf32>
    %8 = arith.addf %5, %7 : vector<32x128xf32>
    %c0_6 = arith.constant 0 : index
    %c0_7 = arith.constant 0 : index
    %c0_8 = arith.constant 0 : index
    %9 = vector.load %arg3[%c0_6, %c0_7, %c0_8] : memref<1x32x128xf32, #tpu.memory_space<vmem>>, vector<1x32x128xf32>
    %10 = vector.shape_cast %9 : vector<1x32x128xf32> to vector<32x128xf32>
    %11 = arith.addf %8, %10 : vector<32x128xf32>
    %c0_9 = arith.constant 0 : index
    %c0_10 = arith.constant 0 : index
    %12 = vector.load %arg6[%c0_9, %c0_10] : memref<192x32xbf16, #tpu.memory_space<vmem>>, vector<192x32xbf16>
    %13 = arith.truncf %11 : vector<32x128xf32> to vector<32x128xbf16>
    %cst = arith.constant dense<0.000000e+00> : vector<192x128xf32>
    %14 = tpu.matmul %12, %13, %cst {dimension_numbers = #tpu.dot_dimension_numbers<[1], [0], [0], [1], [0, 0, 1, 1], [], []>} : vector<192x32xbf16>, vector<32x128xbf16>, vector<192x128xf32> -> vector<192x128xf32>
    %c0_11 = arith.constant 0 : index
    %c0_12 = arith.constant 0 : index
    %15 = vector.load %arg7[%c0_11, %c0_12] : memref<192x1xf32, #tpu.memory_space<vmem>>, vector<192x1xf32>
    %16 = vector.broadcast %15 : vector<192x1xf32> to vector<192x128xf32>
    %17 = arith.mulf %14, %16 : vector<192x128xf32>
    %c0_13 = arith.constant 0 : index
    %c0_14 = arith.constant 0 : index
    %18 = vector.load %arg8[%c0_13, %c0_14] : memref<192x1xf32, #tpu.memory_space<vmem>>, vector<192x1xf32>
    %19 = vector.broadcast %18 : vector<192x1xf32> to vector<192x128xf32>
    %20 = arith.addf %17, %19 : vector<192x128xf32>
    %c0_15 = arith.constant 0 : index
    %c0_16 = arith.constant 0 : index
    %c0_17 = arith.constant 0 : index
    %21 = vector.load %arg9[%c0_15, %c0_16, %c0_17] : memref<1x192x128xf32, #tpu.memory_space<vmem>>, vector<1x192x128xf32>
    %22 = vector.shape_cast %21 : vector<1x192x128xf32> to vector<192x128xf32>
    %23 = vector.shape_cast %20 : vector<192x128xf32> to vector<1x192x128xf32>
    tpu.vector_store %arg9[%c0_15, %c0_16, %c0_17], %23 {strides = array<i32>} : memref<1x192x128xf32, #tpu.memory_space<vmem>>, vector<1x192x128xf32>,
    return
  }
  func.func @transform_0(%arg0: i32, %arg1: i32) -> (i32, i32, i32) {
    %c0_i32 = arith.constant 0 : i32
    %c0_i32_0 = arith.constant 0 : i32
    return %arg0, %c0_i32, %arg1 : i32, i32, i32
  }
  func.func @transform_1(%arg0: i32, %arg1: i32) -> (i32, i32, i32) {
    %c0_i32 = arith.constant 0 : i32
    %c0_i32_0 = arith.constant 0 : i32
    return %arg0, %c0_i32, %arg1 : i32, i32, i32
  }
  func.func @transform_2(%arg0: i32, %arg1: i32) -> (i32, i32) {
    %c0_i32 = arith.constant 0 : i32
    %c0_i32_0 = arith.constant 0 : i32
    %c0_i32_1 = arith.constant 0 : i32
    return %c0_i32, %c0_i32_0 : i32, i32
  }
  func.func @transform_3(%arg0: i32, %arg1: i32) -> (i32, i32) {
    %c0_i32 = arith.constant 0 : i32
    %c0_i32_0 = arith.constant 0 : i32
    %c0_i32_1 = arith.constant 0 : i32
    return %c0_i32, %c0_i32_0 : i32, i32
  }
  func.func @transform_4(%arg0: i32, %arg1: i32) -> (i32, i32) {
    %c0_i32 = arith.constant 0 : i32
    %c0_i32_0 = arith.constant 0 : i32
    %c0_i32_1 = arith.constant 0 : i32
    return %c0_i32, %c0_i32_0 : i32, i32
  }
  func.func @transform_5(%arg0: i32, %arg1: i32) -> (i32, i32) {
    %c0_i32 = arith.constant 0 : i32
    %c0_i32_0 = arith.constant 0 : i32
    %c0_i32_1 = arith.constant 0 : i32
    return %c0_i32, %c0_i32_0 : i32, i32
  }
  func.func @transform_6(%arg0: i32, %arg1: i32) -> (i32, i32) {
    %c0_i32 = arith.constant 0 : i32
    %c0_i32_0 = arith.constant 0 : i32
    %c0_i32_1 = arith.constant 0 : i32
    return %c0_i32, %c0_i32_0 : i32, i32
  }
  func.func @transform_7(%arg0: i32, %arg1: i32) -> (i32, i32, i32) {
    %c0_i32 = arith.constant 0 : i32
    %c0_i32_0 = arith.constant 0 : i32
    return %arg0, %c0_i32, %arg1 : i32, i32, i32
  }
}

</mosaic_0001>

<bundles_post_ra>
// kernel: fused_forward.3
= control target key start
LH: loop header
LB: loop body
LE: loop exit
PB: predicated region body
PF: predicated region fallthrough
CT: control target
= control target key end

     0   :  { %s972_s15 = smov 0   ;;  %s974_s16 = smov 0   ;;  %s1235_s0 = inlined_call_operand.vmem [shape: f32[2,192,896], index: 0, kind: input, shape index: {}]   ;;  %s1236_s1 = inlined_call_operand.vmem [shape: bf16[32,192], index: 1, kind: input, shape index: {}]   ;;  %s1237_s2 = inlined_call_operand.vmem [shape: bf16[2,32,896], index: 2, kind: output, shape index: {0}]   ;;  %s1238_s3 = inlined_call_operand.vmem [shape: f32[2,32,1], index: 3, kind: output, shape index: {1}]   ;;  %s1239_s4 = inlined_call_operand.vmem [shape: f32[2,32,1], index: 4, kind: output, shape index: {2}]  }
   0x1   :  { %s976_s17 = smov 0   ;;  %s978_s18 = smov 0  }
   0x2   :  { %s980_s19 = smov 0   ;;  %s982_s20 = smov 0  }
   0x3   :  { %s984_s21 = smov 0  }
   0x4 LB: > { %s24_s22 = sadd.s32 1, %s935_s19  ;;  %s27_s23 = sadd.s32 1, %s939_s20  ;;  %s943_s21 = sphi %s984_s21, %s15_s21   ;;  %s939_s20 = sphi %s982_s20, %s1246_s20   ;;  %s935_s19 = sphi %s980_s19, %s1245_s19   ;;  %s931_s18 = sphi %s978_s18, %s1244_s18   ;;  %s927_s17 = sphi %s976_s17, %s1243_s17   ;;  %s923_s16 = sphi %s974_s16, %s1242_s16   ;;  %s919_s15 = sphi %s972_s15, %s1241_s15  }
   0x5   : > { %p25_p0 = scmp.ge.s32.totalorder %s24_s22, 7  ;;  %s754_s24 = sadd.s32 4294967295, %s943_s21  }
   0x6   : > { %p43_p1 = scmp.ne.s32.totalorder %s923_s16, %s919_s15  ;;  %p44_p2 = scmp.eq.s32.totalorder %s943_s21, 0 }
   0x7   : > { %s1248_s22 = smov (%p25_p0, %s24_s22), 0  ;;  %s1250_s23 = smov (!%p25_p0, %s27_s23), %s939_s20 }
   0x8   : > { %p29_p3 = scmp.ge.s32.totalorder %s1250_s23, 2  ;;  %p96_p4 = scmp.eq.s32.totalorder %s754_s24, 13 }
   0x9   : > { %s32_s25 = ssub.s32 %s935_s19, %s1248_s22  ;;  %p45_p5 = por %p44_p2, %p43_p1 }
   0xa   : > { %s1252_s23 = smov (%p29_p3, %s1250_s23), 0  ;;  %p1020_p6 = por %p96_p4, %p43_p1 }
   0xb   : > { %s31_s27 = ssub.s32 %s939_s20, %s1252_s23  ;;  %s36_s29 = sadd.s32 1, %s923_s16 }
   0xc   : > { %s33_s28 = sor.u32 %s32_s25, %s31_s27  ;;  %p757_p8 = scmp.ge.s32.totalorder %s943_s21, 14 }
   0xd   : > { %p34_p7 = scmp.eq.s32.totalorder %s33_s28, 0 }
   0xe   : > { %173 = sbr.rel (%p757_p8) target bundleno = 40 (0x28), region = 20 }
   0xf   : > { %s1028_s30 = scalar_select %p34_p7, %s923_s16, %s36_s29  }
  0x15   : > { %176 = sbr.rel (!%p45_p5) target bundleno = 40 (0x28), region = 24  ;;  %s178_s5 = sand.u32 (%p45_p5), 1, %s923_s16  }
  0x16   : > { %s822_s6 = smul.u32 (%p45_p5), 168, %s939_s20 }
  0x17   : > { %s821_s7 = smul.u32 (%p45_p5), 192, %s178_s5 }
  0x18   : > { %s182_s8 = sadd.s32 (%p45_p5), %s935_s19, %s822_s6 }
  0x19   : > { %s758_s9 = sshll.u32 (%p45_p5), %s182_s8, 3  ;;  %s1042_s13 = scalar_lea.vmem (%p45_p5), [#allocation2], %s821_s7 }
  0x1a   : > { %s1037_s12 = scalar_lea.vmem (%p45_p5), %s1235_s0, %s758_s9 }
  0x1b   : > { %v258_v0 = vld [vmem:[%s1037_s12] sm:$0xff] (%p45_p5)  ;;  %v260_v1 = vld [vmem:[%s1037_s12 + $0x38] sm:$0xff] (%p45_p5)  ;;  %v262_v2 = vld [vmem:[%s1037_s12 + $0x70] sm:$0xff] (%p45_p5) }
  0x1c   : > { %259 = vst [vmem:[%s1042_s13] sm:$0xff] %v258_v0  ;;  %261 = vst [vmem:[%s1042_s13 + $0x8] sm:$0xff] %v260_v1  ;;  %v264_v3 = vld [vmem:[%s1037_s12 + $0xa8] sm:$0xff]  ;;  %v266_v4 = vld [vmem:[%s1037_s12 + $0xe0] sm:$0xff] }
  0x1d   : > { %263 = vst [vmem:[%s1042_s13 + $0x10] sm:$0xff] %v262_v2  ;;  %v268_v5 = vld [vmem:[%s1037_s12 + $0x118] sm:$0xff]  ;;  %265 = vst [vmem:[%s1042_s13 + $0x18] sm:$0xff] %v264_v3  ;;  %v270_v6 = vld [vmem:[%s1037_s12 + $0x150] sm:$0xff] }
  0x1e   : > { %267 = vst [vmem:[%s1042_s13 + $0x20] sm:$0xff] %v266_v4  ;;  %269 = vst [vmem:[%s1042_s13 + $0x28] sm:$0xff] %v268_v5  ;;  %v272_v7 = vld [vmem:[%s1037_s12 + $0x188] sm:$0xff]  ;;  %v274_v8 = vld [vmem:[%s1037_s12 + $0x1c0] sm:$0xff] }
  0x1f   : > { %271 = vst [vmem:[%s1042_s13 + $0x30] sm:$0xff] %v270_v6  ;;  %273 = vst [vmem:[%s1042_s13 + $0x38] sm:$0xff] %v272_v7  ;;  %v276_v9 = vld [vmem:[%s1037_s12 + $0x1f8] sm:$0xff]  ;;  %v278_v10 = vld [vmem:[%s1037_s12 + $0x230] sm:$0xff] }
  0x20   : > { %275 = vst [vmem:[%s1042_s13 + $0x40] sm:$0xff] %v274_v8  ;;  %v280_v11 = vld [vmem:[%s1037_s12 + $0x268] sm:$0xff]  ;;  %277 = vst [vmem:[%s1042_s13 + $0x48] sm:$0xff] %v276_v9  ;;  %v282_v12 = vld [vmem:[%s1037_s12 + $0x2a0] sm:$0xff] }
  0x21   : > { %279 = vst [vmem:[%s1042_s13 + $0x50] sm:$0xff] %v278_v10  ;;  %281 = vst [vmem:[%s1042_s13 + $0x58] sm:$0xff] %v280_v11  ;;  %v284_v13 = vld [vmem:[%s1037_s12 + $0x2d8] sm:$0xff]  ;;  %v286_v14 = vld [vmem:[%s1037_s12 + $0x310] sm:$0xff] }
  0x22   : > { %283 = vst [vmem:[%s1042_s13 + $0x60] sm:$0xff] %v282_v12  ;;  %285 = vst [vmem:[%s1042_s13 + $0x68] sm:$0xff] %v284_v13  ;;  %v288_v15 = vld [vmem:[%s1037_s12 + $0x348] sm:$0xff]  ;;  %v290_v16 = vld [vmem:[%s1037_s12 + $0x380] sm:$0xff] }
  0x23   : > { %287 = vst [vmem:[%s1042_s13 + $0x70] sm:$0xff] %v286_v14  ;;  %v292_v17 = vld [vmem:[%s1037_s12 + $0x3b8] sm:$0xff]  ;;  %289 = vst [vmem:[%s1042_s13 + $0x78] sm:$0xff] %v288_v15  ;;  %v294_v18 = vld [vmem:[%s1037_s12 + $0x3f0] sm:$0xff] }
  0x24   : > { %291 = vst [vmem:[%s1042_s13 + $0x80] sm:$0xff] %v290_v16  ;;  %293 = vst [vmem:[%s1042_s13 + $0x88] sm:$0xff] %v292_v17  ;;  %v296_v19 = vld [vmem:[%s1037_s12 + $0x428] sm:$0xff]  ;;  %v298_v20 = vld [vmem:[%s1037_s12 + $0x460] sm:$0xff] }
  0x25   : > { %295 = vst [vmem:[%s1042_s13 + $0x90] sm:$0xff] %v294_v18  ;;  %297 = vst [vmem:[%s1042_s13 + $0x98] sm:$0xff] %v296_v19  ;;  %v300_v21 = vld [vmem:[%s1037_s12 + $0x498] sm:$0xff]  ;;  %v302_v22 = vld [vmem:[%s1037_s12 + $0x4d0] sm:$0xff] }
  0x26   : > { %299 = vst [vmem:[%s1042_s13 + $0xa0] sm:$0xff] %v298_v20  ;;  %v304_v23 = vld [vmem:[%s1037_s12 + $0x508] sm:$0xff]  ;;  %301 = vst [vmem:[%s1042_s13 + $0xa8] sm:$0xff] %v300_v21 }
  0x27   : > { %303 = vst [vmem:[%s1042_s13 + $0xb0] sm:$0xff] %v302_v22  ;;  %305 = vst [vmem:[%s1042_s13 + $0xb8] sm:$0xff] %v304_v23 }
  0x28 PF: > { %p759_p9 = scmp.ge.s32.totalorder %s943_s21, 1  ;;  %p310_p10 = scmp.lt.s32.totalorder %s943_s21, 15 }
  0x2a   : > { %p311_p11 = pnand %p759_p9, %p310_p10 }
  0x2b   : > { %s317_s14 = sand.u32 (!%p311_p11), 1, %s919_s15   ;;  %p351_p12 = scmp.lt.s32.totalorder (!%p311_p11), %s931_s18, 1 }
  0x2c   : > { %314 = sbr.rel (%p311_p11) target bundleno = 480 (0x1e0), region = 62  ;;  %s760_s25 = sshll.u32 (!%p311_p11), %s317_s14, 4 }
  0x2d   : > { %s823_s24 = smul.u32 (!%p311_p11), 192, %s317_s14  ;;  %s1106_s11 = scalar_lea.vmem (!%p311_p11), [#allocation3], %s760_s25 }
  0x2e   : > { %p765_p13 = scmp.ne.s32.totalorder (!%p311_p11), %s927_s17, 0 }
  0x2f   : > { %s1104_s10 = scalar_lea.vmem (!%p311_p11), [#allocation2], %s823_s24 }
  0x33   : > { %s352_s27 = scalar_select %p351_p12, %s931_s18, 1 }
  0x34   : > { %365 = sbr.rel (%p765_p13) target bundleno = 59 (0x3b), region = 70  ;;  %vm366_vm0 = vcmask (!%p765_p13), 7168   ;;  %v945_v24 = vmov (!%p765_p13), 0.0  }
  0x35   : > { %s780_s28 = sshll.u32 %s352_s27, 5 }
  0x36   : > { %s1097_s6 = scalar_lea.vmem %s1238_s3, %s780_s28  ;;  %s1102_s9 = scalar_lea.vmem %s1239_s4, %s780_s28 }
  0x37   : > { %367 = vst.msk [vmem:[%s1097_s6] sm:$0xff] (!%p765_p13), %vm366_vm0, %v945_v24  ;;  %368 = vst.msk [vmem:[%s1097_s6 + $0x8] sm:$0xff] (!%p765_p13), %vm366_vm0, %v945_v24 }
  0x38   : > { %369 = vst.msk [vmem:[%s1097_s6 + $0x10] sm:$0xff] (!%p765_p13), %vm366_vm0, %v945_v24  ;;  %370 = vst.msk [vmem:[%s1097_s6 + $0x18] sm:$0xff] (!%p765_p13), %vm366_vm0, %v945_v24 }
  0x39   : > { %371 = vst.msk [vmem:[%s1102_s9] sm:$0xff] (!%p765_p13), %vm366_vm0, %v945_v24  ;;  %372 = vst.msk [vmem:[%s1102_s9 + $0x8] sm:$0xff] (!%p765_p13), %vm366_vm0, %v945_v24 }
  0x3a   : > { %373 = vst.msk [vmem:[%s1102_s9 + $0x10] sm:$0xff] (!%p765_p13), %vm366_vm0, %v945_v24  ;;  %374 = vst.msk [vmem:[%s1102_s9 + $0x18] sm:$0xff] (!%p765_p13), %vm366_vm0, %v945_v24 }
  0x3b PF: > { %v375_v25 = vld [vmem:[%s1104_s10] sm:$0xff]  ;;  %v376_v26 = vld [vmem:[%s1104_s10 + $0x8] sm:$0xff]  ;;  %v377_v27 = vld [vmem:[%s1104_s10 + $0x10] sm:$0xff]  ;;  %v946_v28 = vmov 0   ;;  %vm433_vm1 = vcmask 523264   ;;  %vm525_vm2 = vcmask 7168  }
  0x3c   : > { %440 = vmatprep.subr.bf16.mxu0 %v946_v28  ;;  %797 = vmatprep.subr.bf16.mxu1 %v946_v28  ;;  %v399_v29 = vpack.c.bf16 %v376_v26, %v375_v25  ;;  %v378_v30 = vld [vmem:[%s1104_s10 + $0x18] sm:$0xff]  ;;  %v379_v32 = vld [vmem:[%s1104_s10 + $0x20] sm:$0xff]  ;;  %v380_v33 = vld [vmem:[%s1104_s10 + $0x28] sm:$0xff]  ;;  %s824_s29 = smul.u32 (%p1020_p6), 28, %s931_s18 }
  0x3d   : > { %v400_v31 = vpack.c.bf16 %v378_v30, %v377_v27  ;;  %v401_v34 = vpack.c.bf16 %v380_v33, %v379_v32  ;;  %v381_v35 = vld [vmem:[%s1104_s10 + $0x30] sm:$0xff]  ;;  %v382_v36 = vld [vmem:[%s1104_s10 + $0x38] sm:$0xff]  ;;  %v885_v37 = vld [vmem:[%s1236_s1 + $0x4] ss:$8 sps:$4 sm:$0xff]  }
  0x3e   : > { %441 = vmatpush1.bf16.msra.mxu0 %v399_v29  ;;  %809 = vmatpush1.bf16.msra.mxu1 %v399_v29  ;;  %v888_v38 = vld [vmem:[%s1236_s1 + $0x14] ss:$8 sps:$4 sm:$0xff]   ;;  %v402_v39 = vpack.c.bf16 %v382_v36, %v381_v35  ;;  %v383_v40 = vld [vmem:[%s1104_s10 + $0x40] sm:$0xff]  ;;  %v384_v41 = vld [vmem:[%s1104_s10 + $0x48] sm:$0xff]  ;;  %s572_s5 = sadd.s32 (%p1020_p6), %s927_s17, %s824_s29 }
  0x3f   : > { %442 = vmatprep.subr.bf16.mxu0 %v946_v28  ;;  %798 = vmatprep.subr.bf16.mxu1 %v946_v28  ;;  %v403_v42 = vpack.c.bf16 %v384_v41, %v383_v40  ;;  %v385_v43 = vld [vmem:[%s1104_s10 + $0x50] sm:$0xff]  ;;  %v386_v44 = vld [vmem:[%s1104_s10 + $0x58] sm:$0xff]  ;;  %v387_v46 = vld [vmem:[%s1104_s10 + $0x60] sm:$0xff] }
  0x40   : > { %770 = vmatprep.mubr.msk.bf16.mxu0 %vm433_vm1, %v885_v37  ;;  %771 = vmatprep.mubr.msk.bf16.mxu1 %vm433_vm1, %v888_v38  ;;  %v404_v45 = vpack.c.bf16 %v386_v44, %v385_v43  ;;  %v388_v47 = vld [vmem:[%s1104_s10 + $0x68] sm:$0xff]  ;;  %v389_v49 = vld [vmem:[%s1104_s10 + $0x70] sm:$0xff]  ;;  %v390_v50 = vld [vmem:[%s1104_s10 + $0x78] sm:$0xff] }
  0x41   : > { %v405_v48 = vpack.c.bf16 %v388_v47, %v387_v46  ;;  %v406_v51 = vpack.c.bf16 %v390_v50, %v389_v49  ;;  %v391_v52 = vld [vmem:[%s1104_s10 + $0x80] sm:$0xff]  ;;  %v392_v53 = vld [vmem:[%s1104_s10 + $0x88] sm:$0xff]  ;;  %v393_v55 = vld [vmem:[%s1104_s10 + $0x90] sm:$0xff] }
  0x42   : > { %443 = vmatpush1.bf16.msra.mxu0 %v400_v31  ;;  %810 = vmatpush1.bf16.msra.mxu1 %v400_v31  ;;  %v407_v54 = vpack.c.bf16 %v392_v53, %v391_v52  ;;  %v394_v56 = vld [vmem:[%s1104_s10 + $0x98] sm:$0xff]  ;;  %v395_v58 = vld [vmem:[%s1104_s10 + $0xa0] sm:$0xff]  ;;  %v396_v59 = vld [vmem:[%s1104_s10 + $0xa8] sm:$0xff] }
  0x43   : > { %444 = vmatprep.subr.bf16.mxu0 %v946_v28  ;;  %799 = vmatprep.subr.bf16.mxu1 %v946_v28  ;;  %v408_v57 = vpack.c.bf16 %v394_v56, %v393_v55  ;;  %v409_v60 = vpack.c.bf16 %v396_v59, %v395_v58  ;;  %v397_v61 = vld [vmem:[%s1104_s10 + $0xb0] sm:$0xff]  ;;  %v398_v62 = vld [vmem:[%s1104_s10 + $0xb8] sm:$0xff]  ;;  %v883_v0 = vld [vmem:[%s1236_s1] ss:$8 sps:$4 sm:$0xff]  }
  0x44   : > { %v410_v63 = vpack.c.bf16 %v398_v62, %v397_v61  ;;  %v886_v1 = vld [vmem:[%s1236_s1 + $0x10] ss:$8 sps:$4 sm:$0xff]   ;;  %v509_v17 = vld [vmem:[%s1097_s6] sm:$0xff]  ;;  %v510_v23 = vld [vmem:[%s1097_s6 + $0x8] sm:$0xff] }
  0x45   : > { %v511_v16 = vld [vmem:[%s1097_s6 + $0x10] sm:$0xff]  ;;  %v512_v22 = vld [vmem:[%s1097_s6 + $0x18] sm:$0xff]  ;;  %v531_v29 = vld [vmem:[%s1102_s9 + $0x8] sm:$0xff] }
  0x46   : > { %445 = vmatpush1.bf16.msra.mxu0 %v401_v34  ;;  %811 = vmatpush1.bf16.msra.mxu1 %v401_v34  ;;  %v532_v34 = vld [vmem:[%s1102_s9 + $0x10] sm:$0xff]  ;;  %v533_v35 = vld [vmem:[%s1102_s9 + $0x18] sm:$0xff] }
  0x47   : > { %446 = vmatprep.subr.bf16.mxu0 %v946_v28  ;;  %800 = vmatprep.subr.bf16.mxu1 %v946_v28 }
  0x4a   : > { %447 = vmatpush1.bf16.msra.mxu0 %v402_v39  ;;  %812 = vmatpush1.bf16.msra.mxu1 %v402_v39 }
  0x4b   : > { %448 = vmatprep.subr.bf16.mxu0 %v946_v28  ;;  %801 = vmatprep.subr.bf16.mxu1 %v946_v28 }
  0x4e   : > { %449 = vmatpush1.bf16.msra.mxu0 %v403_v42  ;;  %813 = vmatpush1.bf16.msra.mxu1 %v403_v42 }
  0x4f   : > { %450 = vmatprep.subr.bf16.mxu0 %v946_v28  ;;  %802 = vmatprep.subr.bf16.mxu1 %v946_v28 }
  0x52   : > { %451 = vmatpush1.bf16.msra.mxu0 %v404_v45  ;;  %814 = vmatpush1.bf16.msra.mxu1 %v404_v45 }
  0x53   : > { %452 = vmatprep.subr.bf16.mxu0 %v946_v28  ;;  %803 = vmatprep.subr.bf16.mxu1 %v946_v28 }
  0x56   : > { %453 = vmatpush1.bf16.msra.mxu0 %v405_v48  ;;  %815 = vmatpush1.bf16.msra.mxu1 %v405_v48 }
  0x57   : > { %454 = vmatprep.subr.bf16.mxu0 %v946_v28  ;;  %804 = vmatprep.subr.bf16.mxu1 %v946_v28 }
  0x5a   : > { %455 = vmatpush1.bf16.msra.mxu0 %v406_v51  ;;  %816 = vmatpush1.bf16.msra.mxu1 %v406_v51 }
  0x5b   : > { %456 = vmatprep.subr.bf16.mxu0 %v946_v28  ;;  %805 = vmatprep.subr.bf16.mxu1 %v946_v28 }
  0x5e   : > { %457 = vmatpush1.bf16.msra.mxu0 %v407_v54  ;;  %817 = vmatpush1.bf16.msra.mxu1 %v407_v54 }
  0x5f   : > { %458 = vmatprep.subr.bf16.mxu0 %v946_v28  ;;  %806 = vmatprep.subr.bf16.mxu1 %v946_v28 }
  0x62   : > { %459 = vmatpush1.bf16.msra.mxu0 %v408_v57  ;;  %818 = vmatpush1.bf16.msra.mxu1 %v408_v57 }
  0x63   : > { %460 = vmatprep.subr.bf16.mxu0 %v946_v28  ;;  %807 = vmatprep.subr.bf16.mxu1 %v946_v28 }
  0x66   : > { %461 = vmatpush1.bf16.msra.mxu0 %v409_v60  ;;  %819 = vmatpush1.bf16.msra.mxu1 %v409_v60 }
  0x67   : > { %462 = vmatprep.subr.bf16.mxu0 %v946_v28  ;;  %808 = vmatprep.subr.bf16.mxu1 %v946_v28  ;;  %v530_v28 = vld [vmem:[%s1102_s9] sm:$0xff] }
  0x6a   : > { %463 = vmatpush1.bf16.msra.mxu0 %v410_v63  ;;  %820 = vmatpush1.bf16.msra.mxu1 %v410_v63 }
  0x6d   : > { %473 = vmatmul.mubr.bf16.vlgmr.msra.gmra.mrb[0].mxu0 %v883_v0  ;;  %481 = vmatmul.mubr.bf16.vlgmr.msra.gmra.mrb[0].mxu1 %v886_v1 }
 0x140   : > { %v474_v2 = vpop.f32.mrb[0].mxu0  ;;  %v482_v3 = vpop.f32.mrb[0].mxu1 }
 0x141   : > { %517 = vadd.xlane.f32.xlu1 %v482_v3  ;;  %v484_v4 = vpop.f32.mrb[1].mxu1  ;;  %513 = vadd.xlane.f32.xlu0 %v474_v2  ;;  %v476_v5 = vpop.f32.mrb[1].mxu0  ;;  %v534_v12 = vmul.f32 %v474_v2, %v474_v2  ;;  %v536_v14 = vmul.f32 %v482_v3, %v482_v3 }
 0x142   : > { %v477_v6 = vpop.f32.mrb[2].mxu0  ;;  %v485_v7 = vpop.f32.mrb[2].mxu1 }
 0x143   : > { %v789_v8 = vpack.c.bf16 %v477_v6, %v474_v2  ;;  %v794_v9 = vpack.c.bf16 %v485_v7, %v482_v3  ;;  %v479_v10 = vpop.f32.mrb[3].mxu0  ;;  %v487_v11 = vpop.f32.mrb[3].mxu1  ;;  %v535_v13 = vmul.f32 %v477_v6, %v477_v6  ;;  %v537_v15 = vmul.f32 %v485_v7, %v485_v7 }
 0x145   : > { %790 = vst [vmem:[%s1106_s11] sm:$0xff] %v789_v8   ;;  %796 = vst [vmem:[%s1106_s11 + $0x8] sm:$0xff] %v794_v9   ;;  %519 = vadd.xlane.f32.xlu1 %v485_v7  ;;  %515 = vadd.xlane.f32.xlu0 %v477_v6 }
 0x149   : > { %538 = vadd.xlane.f32.xlu0 %v534_v12  ;;  %540 = vadd.xlane.f32.xlu1 %v535_v13 }
 0x14c   : > { %v590_v40 = vld [vmem:[%s1106_s11] sm:$0xf] (%p1020_p6)  ;;  %v592_v41 = vld [vmem:[%s1106_s11 + $0x4] sm:$0xf] (%p1020_p6)  ;;  %v594_v42 = vld [vmem:[%s1106_s11 + $0x8] sm:$0xf] (%p1020_p6) }
 0x14d   : > { %542 = vadd.xlane.f32.xlu0 %v536_v14  ;;  %544 = vadd.xlane.f32.xlu1 %v537_v15  ;;  %v596_v43 = vld [vmem:[%s1106_s11 + $0xc] sm:$0xf] (%p1020_p6) }
 0x1ce   : > { %v518_v18 = vpop.xlane.xlu1 %517  ;;  %v514_v19 = vpop.xlane.xlu0 %513 }
 0x1cf   : > { %v523_v20 = vadd.f32 %v518_v18, %v511_v16  ;;  %v521_v21 = vadd.f32 %v514_v19, %v509_v17 }
 0x1d1   : > { %528 = vst.msk [vmem:[%s1097_s6 + $0x10] sm:$0xff] %vm525_vm2, %v523_v20  ;;  %526 = vst.msk [vmem:[%s1097_s6] sm:$0xff] %vm525_vm2, %v521_v21 }
 0x1d2   : > { %v520_v24 = vpop.xlane.xlu1 %519  ;;  %v516_v25 = vpop.xlane.xlu0 %515 }
 0x1d3   : > { %v524_v26 = vadd.f32 %v520_v24, %v512_v22  ;;  %v522_v27 = vadd.f32 %v516_v25, %v510_v23 }
 0x1d5   : > { %529 = vst.msk [vmem:[%s1097_s6 + $0x18] sm:$0xff] %vm525_vm2, %v524_v26  ;;  %527 = vst.msk [vmem:[%s1097_s6 + $0x8] sm:$0xff] %vm525_vm2, %v522_v27  ;;  %s777_s6 = sshll.u32 (%p1020_p6), %s572_s5, 2 }
 0x1d6   : > { %v539_v30 = vpop.xlane.xlu0 %538  ;;  %v541_v31 = vpop.xlane.xlu1 %540 }
 0x1d7   : > { %v546_v32 = vadd.f32 %v539_v30, %v530_v28  ;;  %v547_v33 = vadd.f32 %v541_v31, %v531_v29  ;;  %570 = sbr.rel (!%p1020_p6) target bundleno = 480 (0x1e0), region = 74 }
 0x1d9   : > { %550 = vst.msk [vmem:[%s1102_s9] sm:$0xff] %vm525_vm2, %v546_v32  ;;  %551 = vst.msk [vmem:[%s1102_s9 + $0x8] sm:$0xff] %vm525_vm2, %v547_v33 }
 0x1da   : > { %v543_v36 = vpop.xlane.xlu0 %542  ;;  %v545_v37 = vpop.xlane.xlu1 %544 }
 0x1db   : > { %v548_v38 = vadd.f32 %v543_v36, %v532_v34  ;;  %v549_v39 = vadd.f32 %v545_v37, %v533_v35 }
 0x1dd   : > { %552 = vst.msk [vmem:[%s1102_s9 + $0x10] sm:$0xff] %vm525_vm2, %v548_v38  ;;  %553 = vst.msk [vmem:[%s1102_s9 + $0x18] sm:$0xff] %vm525_vm2, %v549_v39  ;;  %s574_s9 = scalar_lea.vmem (%p1020_p6), %s1237_s2, %s777_s6 }
 0x1de   : > { %591 = vst [vmem:[%s574_s9] sm:$0xf] %v590_v40  ;;  %593 = vst [vmem:[%s574_s9 + $0x1c] sm:$0xf] %v592_v41 }
 0x1df   : > { %595 = vst [vmem:[%s574_s9 + $0x38] sm:$0xf] %v594_v42  ;;  %597 = vst [vmem:[%s574_s9 + $0x54] sm:$0xf] %v596_v43 }
 0x1e0 PF: > { %s15_s21 = sadd.s32 1, %s943_s21   ;;  %s1241_s15 = smov %s923_s16 }
 0x1e1   : > { %p12_p0 = scmp.ge.s32.totalorder %s15_s21, 16   ;;  %s1242_s16 = smov %s1028_s30 }
 0x1e2   : > { %s1243_s17 = smov %s935_s19  ;;  %s1244_s18 = smov %s939_s20 }
 0x1e3   : > { %s1245_s19 = smov %s1248_s22  ;;  %s1246_s20 = smov %s1252_s23 }
 0x1e4   :  { %14 = sbr.rel (!%p12_p0) target bundleno = 4 (0x4), region = 170 }

// kernel: fused_forward.4
= control target key start
LH: loop header
LB: loop body
LE: loop exit
PB: predicated region body
PF: predicated region fallthrough
CT: control target
= control target key end

     0   :  { %s1454_s21 = smov 0   ;;  %s1456_s22 = smov 0   ;;  %s1911_s0 = inlined_call_operand.vmem [shape: bf16[2,32,896], index: 0, kind: input, shape index: {}]   ;;  %s1912_s1 = inlined_call_operand.vmem [shape: f32[2,32,896], index: 1, kind: input, shape index: {}]   ;;  %s1913_s2 = inlined_call_operand.vmem [shape: f32[32,1], index: 2, kind: input, shape index: {}]   ;;  %s1914_s3 = inlined_call_operand.vmem [shape: f32[32,1], index: 3, kind: input, shape index: {}]   ;;  %s1915_s4 = inlined_call_operand.vmem [shape: bf16[192,32], index: 4, kind: input, shape index: {}]   ;;  %s1916_s5 = inlined_call_operand.vmem [shape: f32[2,192,1], index: 5, kind: output, shape index: {0}]   ;;  %s1917_s6 = inlined_call_operand.vmem [shape: f32[2,192,1], index: 6, kind: output, shape index: {1}]  }
   0x1   :  { %s1458_s23 = smov 0   ;;  %s1460_s24 = smov 0  }
   0x2   :  { %s1462_s25 = smov 0   ;;  %s1464_s26 = smov 0  }
   0x3   :  { %s1466_s27 = smov 0  }
   0x4 LB: > { %s26_s28 = sadd.s32 1, %s1407_s25  ;;  %s29_s29 = sadd.s32 1, %s1411_s26  ;;  %s1415_s27 = sphi %s1466_s27, %s17_s27   ;;  %s1411_s26 = sphi %s1464_s26, %s1926_s26   ;;  %s1407_s25 = sphi %s1462_s25, %s1925_s25   ;;  %s1403_s24 = sphi %s1460_s24, %s1924_s24   ;;  %s1399_s23 = sphi %s1458_s23, %s1923_s23   ;;  %s1395_s22 = sphi %s1456_s22, %s1922_s22   ;;  %s1391_s21 = sphi %s1454_s21, %s1921_s21  }
   0x5   : > { %p27_p0 = scmp.ge.s32.totalorder %s26_s28, 7  ;;  %p45_p1 = scmp.ne.s32.totalorder %s1395_s22, %s1391_s21 }
   0x6   : > { %p46_p2 = scmp.eq.s32.totalorder %s1415_s27, 0  ;;  %s38_s10 = sadd.s32 1, %s1395_s22 }
   0x7   : > { %s1928_s28 = smov (%p27_p0, %s26_s28), 0  ;;  %s1930_s29 = smov (!%p27_p0, %s29_s29), %s1411_s26 }
   0x8   : > { %p1497_p3 = por %p46_p2, %p45_p1  ;;  %p31_p4 = scmp.ge.s32.totalorder %s1930_s29, 2 }
   0x9   : > { %s34_s7 = ssub.s32 %s1407_s25, %s1928_s28  ;;  %p1187_p6 = scmp.ge.s32.totalorder %s1415_s27, 14 }
   0xa   : > { %s1932_s29 = smov (%p31_p4, %s1930_s29), 0 }
   0xb   : > { %s33_s8 = ssub.s32 %s1411_s26, %s1932_s29  ;;  %223 = sbr.rel (%p1187_p6) target bundleno = 36 (0x24), region = 28 }
   0xc   : > { %s35_s9 = sor.u32 %s34_s7, %s33_s8 }
   0xd   : > { %p36_p5 = scmp.eq.s32.totalorder %s35_s9, 0 }
   0xf   : > { %s1509_s11 = scalar_select %p36_p5, %s1395_s22, %s38_s10  }
  0x12   : > { %226 = sbr.rel (!%p1497_p3) target bundleno = 27 (0x1b), region = 32  ;;  %s228_s12 = sand.u32 (%p1497_p3), 1, %s1395_s22  }
  0x13   : > { %s1286_s13 = smul.u32 (%p1497_p3), 28, %s1411_s26  ;;  %s1188_s14 = sshll.u32 (%p1497_p3), %s228_s12, 4 }
  0x14   : > { %s230_s20 = scalar_lea.vmem (%p1497_p3), [#allocation2], %s1188_s14 }
  0x15   : > { %s232_s15 = sadd.s32 (%p1497_p3), %s1407_s25, %s1286_s13 }
  0x16   : > { %s1189_s16 = sshll.u32 (%p1497_p3), %s232_s15, 2 }
  0x17   : > { %s234_s19 = scalar_lea.vmem (%p1497_p3), %s1911_s0, %s1189_s16 }
  0x18   : > { %v250_v0 = vld [vmem:[%s234_s19] sm:$0xf] (%p1497_p3)  ;;  %v252_v1 = vld [vmem:[%s234_s19 + $0x1c] sm:$0xf] (%p1497_p3)  ;;  %v254_v2 = vld [vmem:[%s234_s19 + $0x38] sm:$0xf] (%p1497_p3) }
  0x19   : > { %251 = vst [vmem:[%s230_s20] sm:$0xf] %v250_v0  ;;  %253 = vst [vmem:[%s230_s20 + $0x4] sm:$0xf] %v252_v1  ;;  %v256_v3 = vld [vmem:[%s234_s19 + $0x54] sm:$0xf] }
  0x1a   : > { %255 = vst [vmem:[%s230_s20 + $0x8] sm:$0xf] %v254_v2  ;;  %257 = vst [vmem:[%s230_s20 + $0xc] sm:$0xf] %v256_v3 }
  0x1b PF: > { %288 = sbr.rel (!%p1497_p3) target bundleno = 36 (0x24), region = 73  ;;  %s290_s7 = sand.u32 (%p1497_p3), 1, %s1395_s22  }
  0x1c   : > { %s1287_s8 = smul.u32 (%p1497_p3), 28, %s1411_s26  ;;  %s1190_s9 = sshll.u32 (%p1497_p3), %s290_s7, 5 }
  0x1d   : > { %s292_s16 = scalar_lea.vmem (%p1497_p3), [#allocation3], %s1190_s9 }
  0x1e   : > { %s294_s10 = sadd.s32 (%p1497_p3), %s1407_s25, %s1287_s8 }
  0x1f   : > { %s1191_s12 = sshll.u32 (%p1497_p3), %s294_s10, 3 }
  0x20   : > { %s296_s14 = scalar_lea.vmem (%p1497_p3), %s1912_s1, %s1191_s12 }
  0x21   : > { %v330_v4 = vld [vmem:[%s296_s14] sm:$0xff] (%p1497_p3)  ;;  %v332_v5 = vld [vmem:[%s296_s14 + $0x38] sm:$0xff] (%p1497_p3)  ;;  %v334_v6 = vld [vmem:[%s296_s14 + $0x70] sm:$0xff] (%p1497_p3) }
  0x22   : > { %331 = vst [vmem:[%s292_s16] sm:$0xff] %v330_v4  ;;  %333 = vst [vmem:[%s292_s16 + $0x8] sm:$0xff] %v332_v5  ;;  %v336_v7 = vld [vmem:[%s296_s14 + $0xa8] sm:$0xff] }
  0x23   : > { %335 = vst [vmem:[%s292_s16 + $0x10] sm:$0xff] %v334_v6  ;;  %337 = vst [vmem:[%s292_s16 + $0x18] sm:$0xff] %v336_v7 }
  0x24 PF: > { %p1192_p7 = scmp.ge.s32.totalorder %s1415_s27, 1  ;;  %p342_p8 = scmp.lt.s32.totalorder %s1415_s27, 15 }
  0x26   : > { %p343_p9 = pnand %p1192_p7, %p342_p8 }
  0x27   : > { %s349_s30 = sand.u32 (!%p343_p9), 1, %s1391_s21   ;;  %p394_p10 = scmp.lt.s32.totalorder (!%p343_p9), %s1403_s24, 1 }
  0x28   : > { %346 = sbr.rel (%p343_p9) target bundleno = 680 (0x2a8), region = 111  ;;  %s1532_s17 = sshll.u32 (!%p343_p9), %s349_s30, 4 }
  0x29   : > { %s1194_s18 = sshll.u32 (!%p343_p9), %s349_s30, 5  ;;  %s351_s13 = scalar_lea.vmem (!%p343_p9), [#allocation2], %s1532_s17 }
  0x2a   : > { %s1546_s15 = scalar_lea.vmem (!%p343_p9), [#allocation3], %s1194_s18  ;;  %p1197_p11 = scmp.ne.s32.totalorder (!%p343_p9), %s1399_s23, 0 }
  0x2f   : > { %s1934_s24 = smov (!%p394_p10, %s1403_s24), 1  ;;  %408 = sbr.rel (%p1197_p11) target bundleno = 75 (0x4b), region = 123 }
  0x30   : > { %s1288_s19 = smul.u32 192, %s1934_s24  ;;  %vm409_vm0 = vcmask (!%p1197_p11), 7168   ;;  %v1417_v8 = vmov (!%p1197_p11), 0.0  }
  0x32   : > { %s1538_s8 = scalar_lea.vmem %s1916_s5, %s1288_s19  ;;  %s1543_s12 = scalar_lea.vmem %s1917_s6, %s1288_s19 }
  0x33   : > { %410 = vst.msk [vmem:[%s1538_s8] sm:$0xff] (!%p1197_p11), %vm409_vm0, %v1417_v8  ;;  %411 = vst.msk [vmem:[%s1538_s8 + $0x8] sm:$0xff] (!%p1197_p11), %vm409_vm0, %v1417_v8 }
  0x34   : > { %412 = vst.msk [vmem:[%s1538_s8 + $0x10] sm:$0xff] (!%p1197_p11), %vm409_vm0, %v1417_v8  ;;  %413 = vst.msk [vmem:[%s1538_s8 + $0x18] sm:$0xff] (!%p1197_p11), %vm409_vm0, %v1417_v8 }
  0x35   : > { %414 = vst.msk [vmem:[%s1538_s8 + $0x20] sm:$0xff] (!%p1197_p11), %vm409_vm0, %v1417_v8  ;;  %415 = vst.msk [vmem:[%s1538_s8 + $0x28] sm:$0xff] (!%p1197_p11), %vm409_vm0, %v1417_v8 }
  0x36   : > { %416 = vst.msk [vmem:[%s1538_s8 + $0x30] sm:$0xff] %vm409_vm0, %v1417_v8  ;;  %417 = vst.msk [vmem:[%s1538_s8 + $0x38] sm:$0xff] %vm409_vm0, %v1417_v8 }
  0x37   : > { %418 = vst.msk [vmem:[%s1538_s8 + $0x40] sm:$0xff] %vm409_vm0, %v1417_v8  ;;  %419 = vst.msk [vmem:[%s1538_s8 + $0x48] sm:$0xff] %vm409_vm0, %v1417_v8 }
  0x38   : > { %420 = vst.msk [vmem:[%s1538_s8 + $0x50] sm:$0xff] %vm409_vm0, %v1417_v8  ;;  %421 = vst.msk [vmem:[%s1538_s8 + $0x58] sm:$0xff] %vm409_vm0, %v1417_v8 }
  0x39   : > { %422 = vst.msk [vmem:[%s1538_s8 + $0x60] sm:$0xff] %vm409_vm0, %v1417_v8  ;;  %423 = vst.msk [vmem:[%s1538_s8 + $0x68] sm:$0xff] %vm409_vm0, %v1417_v8 }
  0x3a   : > { %424 = vst.msk [vmem:[%s1538_s8 + $0x70] sm:$0xff] %vm409_vm0, %v1417_v8  ;;  %425 = vst.msk [vmem:[%s1538_s8 + $0x78] sm:$0xff] %vm409_vm0, %v1417_v8 }
  0x3b   : > { %426 = vst.msk [vmem:[%s1538_s8 + $0x80] sm:$0xff] %vm409_vm0, %v1417_v8  ;;  %427 = vst.msk [vmem:[%s1538_s8 + $0x88] sm:$0xff] %vm409_vm0, %v1417_v8 }
  0x3c   : > { %428 = vst.msk [vmem:[%s1538_s8 + $0x90] sm:$0xff] %vm409_vm0, %v1417_v8  ;;  %429 = vst.msk [vmem:[%s1538_s8 + $0x98] sm:$0xff] %vm409_vm0, %v1417_v8 }
  0x3d   : > { %430 = vst.msk [vmem:[%s1538_s8 + $0xa0] sm:$0xff] %vm409_vm0, %v1417_v8  ;;  %431 = vst.msk [vmem:[%s1538_s8 + $0xa8] sm:$0xff] %vm409_vm0, %v1417_v8 }
  0x3e   : > { %432 = vst.msk [vmem:[%s1538_s8 + $0xb0] sm:$0xff] %vm409_vm0, %v1417_v8  ;;  %433 = vst.msk [vmem:[%s1538_s8 + $0xb8] sm:$0xff] %vm409_vm0, %v1417_v8 }
  0x3f   : > { %434 = vst.msk [vmem:[%s1543_s12] sm:$0xff] %vm409_vm0, %v1417_v8  ;;  %435 = vst.msk [vmem:[%s1543_s12 + $0x8] sm:$0xff] %vm409_vm0, %v1417_v8 }
  0x40   : > { %436 = vst.msk [vmem:[%s1543_s12 + $0x10] sm:$0xff] %vm409_vm0, %v1417_v8  ;;  %437 = vst.msk [vmem:[%s1543_s12 + $0x18] sm:$0xff] %vm409_vm0, %v1417_v8 }
  0x41   : > { %438 = vst.msk [vmem:[%s1543_s12 + $0x20] sm:$0xff] %vm409_vm0, %v1417_v8  ;;  %439 = vst.msk [vmem:[%s1543_s12 + $0x28] sm:$0xff] %vm409_vm0, %v1417_v8 }
  0x42   : > { %440 = vst.msk [vmem:[%s1543_s12 + $0x30] sm:$0xff] %vm409_vm0, %v1417_v8  ;;  %441 = vst.msk [vmem:[%s1543_s12 + $0x38] sm:$0xff] %vm409_vm0, %v1417_v8 }
  0x43   : > { %442 = vst.msk [vmem:[%s1543_s12 + $0x40] sm:$0xff] %vm409_vm0, %v1417_v8  ;;  %443 = vst.msk [vmem:[%s1543_s12 + $0x48] sm:$0xff] %vm409_vm0, %v1417_v8 }
  0x44   : > { %444 = vst.msk [vmem:[%s1543_s12 + $0x50] sm:$0xff] %vm409_vm0, %v1417_v8  ;;  %445 = vst.msk [vmem:[%s1543_s12 + $0x58] sm:$0xff] %vm409_vm0, %v1417_v8 }
  0x45   : > { %446 = vst.msk [vmem:[%s1543_s12 + $0x60] sm:$0xff] %vm409_vm0, %v1417_v8  ;;  %447 = vst.msk [vmem:[%s1543_s12 + $0x68] sm:$0xff] %vm409_vm0, %v1417_v8 }
  0x46   : > { %448 = vst.msk [vmem:[%s1543_s12 + $0x70] sm:$0xff] %vm409_vm0, %v1417_v8  ;;  %449 = vst.msk [vmem:[%s1543_s12 + $0x78] sm:$0xff] %vm409_vm0, %v1417_v8 }
  0x47   : > { %450 = vst.msk [vmem:[%s1543_s12 + $0x80] sm:$0xff] %vm409_vm0, %v1417_v8  ;;  %451 = vst.msk [vmem:[%s1543_s12 + $0x88] sm:$0xff] %vm409_vm0, %v1417_v8 }
  0x48   : > { %452 = vst.msk [vmem:[%s1543_s12 + $0x90] sm:$0xff] %vm409_vm0, %v1417_v8  ;;  %453 = vst.msk [vmem:[%s1543_s12 + $0x98] sm:$0xff] %vm409_vm0, %v1417_v8 }
  0x49   : > { %454 = vst.msk [vmem:[%s1543_s12 + $0xa0] sm:$0xff] %vm409_vm0, %v1417_v8  ;;  %455 = vst.msk [vmem:[%s1543_s12 + $0xa8] sm:$0xff] %vm409_vm0, %v1417_v8 }
  0x4a   : > { %456 = vst.msk [vmem:[%s1543_s12 + $0xb0] sm:$0xff] %vm409_vm0, %v1417_v8  ;;  %457 = vst.msk [vmem:[%s1543_s12 + $0xb8] sm:$0xff] %vm409_vm0, %v1417_v8 }
  0x4b PF: > { %v494_v9 = vld [vmem:[%s1914_s3] sm:$0xff]  ;;  %v1418_v11 = vmov 0   ;;  %v495_v12 = vld [vmem:[%s1914_s3 + $0x8] sm:$0xff]  ;;  %v469_v14 = vld [vmem:[%s1913_s2 + $0x18] sm:$0xff]  ;;  %vm626_vm1 = vcmask 261120   ;;  %v531_v21 = vlaneseq  ;;  %s1198_s9 = sshll.u32 %s1399_s23, 7 }
  0x4c   : > { %v466_v10 = vld [vmem:[%s1913_s2] sm:$0xff]  ;;  %1348 = vset.pattern.permute.xlu1 %v1418_v11  ;;  %1347 = vset.pattern.permute.xlu0 %v1418_v11  ;;  %v467_v13 = vld [vmem:[%s1913_s2 + $0x8] sm:$0xff]  ;;  %v468_v15 = vld [vmem:[%s1913_s2 + $0x10] sm:$0xff]  ;;  %v533_v26 = vstv %s1198_s9  ;;  %vm888_vm4 = vcmask 7168  }
  0x4d   : > { %500 = vperm.xlu1 %1348, %v494_v9   ;;  %472 = vperm.xlu0 %1347, %v466_v10   ;;  %v497_v16 = vld [vmem:[%s1914_s3 + $0x18] sm:$0xff]  ;;  %v496_v17 = vld [vmem:[%s1914_s3 + $0x10] sm:$0xff]  ;;  %v1349_v18 = vld [vmem:[%s1915_s4] sm:$0xff]   ;;  %v532_v23 = vand.u32 127, %v531_v21 }
  0x4e   : > { %v1350_v19 = vld [vmem:[%s1915_s4 + $0x30] sm:$0xff]   ;;  %1258 = vmatprep.mubr.msk.bf16.mxu0 %vm626_vm1, %v1349_v18  ;;  %v1239_v32 = vld [vmem:[%s351_s13 + $0x8] sm:$0xff]   ;;  %v522_v35 = vld [vmem:[%s1546_s15] sm:$0xff] }
  0x4f   : > { %1270 = vmatprep.mubr.msk.bf16.mxu1 %vm626_vm1, %v1350_v19  ;;  %v1232_v20 = vld [vmem:[%s351_s13] sm:$0xff]   ;;  %v534_v29 = vadd.s32 %v533_v26, %v532_v23  ;;  %v523_v36 = vld [vmem:[%s1546_s15 + $0x8] sm:$0xff]  ;;  %v1238_v38 = vunpack.c.h.bf16 %v1239_v32  ;;  %v1237_v39 = vunpack.c.l.bf16 %v1239_v32  ;;  %v525_v48 = vld [vmem:[%s1546_s15 + $0x18] sm:$0xff] }
  0x50   : > { %v1233_v22 = vunpack.c.l.bf16 %v1232_v20  ;;  %v1234_v28 = vunpack.c.h.bf16 %v1232_v20  ;;  %v524_v50 = vld [vmem:[%s1546_s15 + $0x10] sm:$0xff]  ;;  %v1351_v57 = vld [vmem:[%s1915_s4 + $0x8] sm:$0xff]   ;;  %v1352_v58 = vld [vmem:[%s1915_s4 + $0x38] sm:$0xff]  }
  0x51   : > { %505 = vperm.xlu1 %1348, %v495_v12   ;;  %477 = vperm.xlu0 %1347, %v467_v13   ;;  %vm535_vm2 = vcmp.lt.s32.totalorder %v534_v29, 784  ;;  %v1353_v59 = vld [vmem:[%s1915_s4 + $0x10] sm:$0xff]   ;;  %v1355_v60 = vld [vmem:[%s1915_s4 + $0x40] sm:$0xff]   ;;  %v1354_v61 = vld [vmem:[%s1915_s4 + $0x18] sm:$0xff]  }
  0x52   : > { %vm1684_vm3 = vmpackc.low %vm535_vm2, %vm535_vm2  ;;  %v1356_v62 = vld [vmem:[%s1915_s4 + $0x48] sm:$0xff]   ;;  %v1357_v63 = vld [vmem:[%s1915_s4 + $0x20] sm:$0xff]  }
  0x53   : > { %v1359_v0 = vld [vmem:[%s1915_s4 + $0x50] sm:$0xff]   ;;  %v1358_v1 = vld [vmem:[%s1915_s4 + $0x28] sm:$0xff]   ;;  %v1360_v2 = vld [vmem:[%s1915_s4 + $0x58] sm:$0xff]  }
  0x55   : > { %487 = vperm.xlu1 %1348, %v469_v14   ;;  %482 = vperm.xlu0 %1347, %v468_v15  }
  0x59   : > { %515 = vperm.xlu1 %1348, %v497_v16   ;;  %510 = vperm.xlu0 %1347, %v496_v17  }
  0xcc   : > { %v501_v24 = vpop.permute.xlu1 %500  ;;  %v473_v25 = vpop.permute.xlu0 %472 }
  0xcd   : > { %v490_v27 = vmul.f32 %v1233_v22, %v473_v25 }
  0xcf   : > { %v518_v33 = vadd.f32 %v501_v24, %v490_v27 }
  0xd0   : > { %v506_v30 = vpop.permute.xlu1 %505  ;;  %v478_v31 = vpop.permute.xlu0 %477 }
  0xd1   : > { %v491_v34 = vmul.f32 %v1234_v28, %v478_v31  ;;  %v526_v42 = vadd.f32 %v522_v35, %v518_v33 }
  0xd3   : > { %v519_v37 = vadd.f32 %v506_v30, %v491_v34 }
  0xd4   : > { %v488_v40 = vpop.permute.xlu1 %487  ;;  %v483_v41 = vpop.permute.xlu0 %482 }
  0xd5   : > { %v527_v43 = vadd.f32 %v523_v36, %v519_v37  ;;  %v493_v46 = vmul.f32 %v1238_v38, %v488_v40  ;;  %v492_v47 = vmul.f32 %v1237_v39, %v483_v41 }
  0xd7   : > { %v1212_v45 = vpack.c.bf16 %v527_v43, %v526_v42 }
  0xd8   : > { %v516_v49 = vpop.permute.xlu1 %515  ;;  %v511_v51 = vpop.permute.xlu0 %510 }
  0xd9   : > { %v521_v52 = vadd.f32 %v516_v49, %v493_v46  ;;  %v520_v53 = vadd.f32 %v511_v51, %v492_v47  ;;  %1254 = vmatprep.subr.msk.bf16.mxu0 %vm1684_vm3, %v1212_v45  ;;  %1282 = vmatprep.subr.msk.bf16.mxu1 %vm1684_vm3, %v1212_v45  ;;  %v806_v51 = vld [vmem:[%s1538_s8 + $0x70] sm:$0xff] }
  0xda   : > { %1255 = vmatpush3.bf16.msk.msra.mxu0 %vm1684_vm3, %v1212_v45  ;;  %1284 = vmatpush3.bf16.msk.msra.mxu1 %vm1684_vm3, %v1212_v45 }
  0xdb   : > { %v529_v54 = vadd.f32 %v525_v48, %v521_v52  ;;  %v528_v55 = vadd.f32 %v524_v50, %v520_v53  ;;  %v794_v52 = vld [vmem:[%s1538_s8 + $0x10] sm:$0xff] }
  0xdd   : > { %v1215_v56 = vpack.c.bf16 %v529_v54, %v528_v55 }
  0xdf   : > { %1256 = vmatprep.subr.msk.bf16.mxu0 %vm1684_vm3, %v1215_v56  ;;  %1283 = vmatprep.subr.msk.bf16.mxu1 %vm1684_vm3, %v1215_v56 }
  0xe0   : > { %1257 = vmatpush3.bf16.msk.msra.mxu0 %vm1684_vm3, %v1215_v56  ;;  %1285 = vmatpush3.bf16.msk.msra.mxu1 %vm1684_vm3, %v1215_v56 }
  0xe3   : > { %1259 = vmatmul.mubr.msk.bf16.vlgmr.msra.gmra.mrb[0].mxu0 %vm626_vm1, %v1351_v57  ;;  %1271 = vmatmul.mubr.msk.bf16.vlgmr.msra.gmra.mrb[0].mxu1 %vm626_vm1, %v1352_v58  ;;  %v804_v57 = vld [vmem:[%s1538_s8 + $0x60] sm:$0xff] }
  0xe4   : > { %1262 = vmatprep.mubr.msk.bf16.mxu0 %vm626_vm1, %v1353_v59  ;;  %1274 = vmatprep.mubr.msk.bf16.mxu1 %vm626_vm1, %v1355_v60  ;;  %v792_v58 = vld [vmem:[%s1538_s8] sm:$0xff] }
  0xeb   : > { %1263 = vmatmul.mubr.msk.bf16.gmra.mrb[4].mxu0 %vm626_vm1, %v1354_v61  ;;  %1275 = vmatmul.mubr.msk.bf16.gmra.mrb[4].mxu1 %vm626_vm1, %v1356_v62 }
  0xec   : > { %1266 = vmatprep.mubr.msk.bf16.mxu0 %vm626_vm1, %v1357_v63  ;;  %1278 = vmatprep.mubr.msk.bf16.mxu1 %vm626_vm1, %v1359_v0  ;;  %v915_v63 = vld [vmem:[%s1543_s12 + $0x10] sm:$0xff]  ;;  %v795_v0 = vld [vmem:[%s1538_s8 + $0x18] sm:$0xff] }
  0xf3   : > { %1267 = vmatmul.mubr.msk.bf16.gmra.mrb[8].mxu0 %vm626_vm1, %v1358_v1  ;;  %1279 = vmatmul.mubr.msk.bf16.gmra.mrb[8].mxu1 %vm626_vm1, %v1360_v2 }
 0x1b6   : > { %v1260_v3 = vpop.f32.mrb[0].mxu0  ;;  %v1272_v4 = vpop.f32.mrb[0].mxu1 }
 0x1b7   : > { %844 = vadd.xlane.f32.xlu1 %v1272_v4  ;;  %820 = vadd.xlane.f32.xlu0 %v1260_v3  ;;  %v697_v5 = vpop.f32.mrb[1].mxu0  ;;  %v745_v6 = vpop.f32.mrb[1].mxu1  ;;  %v939_v11 = vmul.f32 %v1260_v3, %v1260_v3  ;;  %v951_v18 = vmul.f32 %v1272_v4, %v1272_v4 }
 0x1b8   : > { %v1261_v7 = vpop.f32.mrb[2].mxu0  ;;  %v1273_v8 = vpop.f32.mrb[2].mxu1  ;;  %v937_v28 = vmul.f32 %v697_v5, %v697_v5  ;;  %v949_v32 = vmul.f32 %v745_v6, %v745_v6 }
 0x1b9   : > { %v700_v9 = vpop.f32.mrb[3].mxu0  ;;  %v748_v10 = vpop.f32.mrb[3].mxu1  ;;  %v940_v27 = vmul.f32 %v1261_v7, %v1261_v7  ;;  %v952_v31 = vmul.f32 %v1273_v8, %v1273_v8 }
 0x1ba   : > { %v938_v33 = vmul.f32 %v700_v9, %v700_v9  ;;  %v950_v34 = vmul.f32 %v748_v10, %v748_v10 }
 0x1bb   : > { %840 = vadd.xlane.f32.xlu1 %v745_v6  ;;  %816 = vadd.xlane.f32.xlu0 %v697_v5  ;;  %v927_v5 = vld [vmem:[%s1543_s12 + $0x70] sm:$0xff]  ;;  %v807_v6 = vld [vmem:[%s1538_s8 + $0x78] sm:$0xff] }
 0x1be   : > { %v1264_v12 = vpop.f32.mrb[4].mxu0  ;;  %v1276_v13 = vpop.f32.mrb[4].mxu1 }
 0x1bf   : > { %965 = vadd.xlane.f32.xlu1 %v939_v11  ;;  %822 = vadd.xlane.f32.xlu0 %v1261_v7  ;;  %v713_v14 = vpop.f32.mrb[5].mxu0  ;;  %v761_v15 = vpop.f32.mrb[5].mxu1  ;;  %v943_v35 = vmul.f32 %v1264_v12, %v1264_v12  ;;  %v955_v36 = vmul.f32 %v1276_v13, %v1276_v13  ;;  %v805_v11 = vld [vmem:[%s1538_s8 + $0x68] sm:$0xff] }
 0x1c0   : > { %v1265_v16 = vpop.f32.mrb[6].mxu0  ;;  %v1277_v17 = vpop.f32.mrb[6].mxu1  ;;  %v941_v37 = vmul.f32 %v713_v14, %v713_v14  ;;  %v953_v39 = vmul.f32 %v761_v15, %v761_v15 }
 0x1c1   : > { %v716_v19 = vpop.f32.mrb[7].mxu0  ;;  %v764_v20 = vpop.f32.mrb[7].mxu1  ;;  %v944_v38 = vmul.f32 %v1265_v16, %v1265_v16  ;;  %v956_v40 = vmul.f32 %v1277_v17, %v1277_v17 }
 0x1c2   : > { %v942_v41 = vmul.f32 %v716_v19, %v716_v19  ;;  %v954_v42 = vmul.f32 %v764_v20, %v764_v20 }
 0x1c3   : > { %989 = vadd.xlane.f32.xlu1 %v951_v18  ;;  %846 = vadd.xlane.f32.xlu0 %v1273_v8  ;;  %v913_v18 = vld [vmem:[%s1543_s12] sm:$0xff] }
 0x1c6   : > { %v1268_v21 = vpop.f32.mrb[8].mxu0  ;;  %v1280_v22 = vpop.f32.mrb[8].mxu1 }
 0x1c7   : > { %842 = vadd.xlane.f32.xlu0 %v748_v10  ;;  %818 = vadd.xlane.f32.xlu1 %v700_v9  ;;  %v729_v23 = vpop.f32.mrb[9].mxu0  ;;  %v777_v24 = vpop.f32.mrb[9].mxu1  ;;  %v947_v43 = vmul.f32 %v1268_v21, %v1268_v21  ;;  %v959_v48 = vmul.f32 %v1280_v22, %v1280_v22 }
 0x1c8   : > { %v1269_v25 = vpop.f32.mrb[10].mxu0  ;;  %v1281_v26 = vpop.f32.mrb[10].mxu1  ;;  %v945_v44 = vmul.f32 %v729_v23, %v729_v23  ;;  %v957_v45 = vmul.f32 %v777_v24, %v777_v24 }
 0x1c9   : > { %v732_v29 = vpop.f32.mrb[11].mxu0  ;;  %v780_v30 = vpop.f32.mrb[11].mxu1  ;;  %v948_v46 = vmul.f32 %v1269_v25, %v1269_v25  ;;  %v960_v50 = vmul.f32 %v1281_v26, %v1281_v26 }
 0x1ca   : > { %v946_v47 = vmul.f32 %v732_v29, %v732_v29  ;;  %v958_v49 = vmul.f32 %v780_v30, %v780_v30 }
 0x1cb   : > { %967 = vadd.xlane.f32.xlu0 %v940_v27  ;;  %961 = vadd.xlane.f32.xlu1 %v937_v28 }
 0x1cf   : > { %991 = vadd.xlane.f32.xlu0 %v952_v31  ;;  %985 = vadd.xlane.f32.xlu1 %v949_v32 }
 0x1d3   : > { %963 = vadd.xlane.f32.xlu0 %v938_v33  ;;  %828 = vadd.xlane.f32.xlu1 %v1264_v12  ;;  %v793_v12 = vld [vmem:[%s1538_s8 + $0x8] sm:$0xff] }
 0x1d7   : > { %987 = vadd.xlane.f32.xlu0 %v950_v34  ;;  %852 = vadd.xlane.f32.xlu1 %v1276_v13 }
 0x1db   : > { %824 = vadd.xlane.f32.xlu1 %v713_v14  ;;  %830 = vadd.xlane.f32.xlu0 %v1265_v16 }
 0x1df   : > { %848 = vadd.xlane.f32.xlu1 %v761_v15  ;;  %854 = vadd.xlane.f32.xlu0 %v1277_v17  ;;  %v916_v17 = vld [vmem:[%s1543_s12 + $0x18] sm:$0xff] }
 0x1e3   : > { %973 = vadd.xlane.f32.xlu1 %v943_v35  ;;  %826 = vadd.xlane.f32.xlu0 %v716_v19  ;;  %v926_v35 = vld [vmem:[%s1543_s12 + $0x68] sm:$0xff] }
 0x1e7   : > { %997 = vadd.xlane.f32.xlu1 %v955_v36  ;;  %850 = vadd.xlane.f32.xlu0 %v764_v20  ;;  %v810_v36 = vld [vmem:[%s1538_s8 + $0x90] sm:$0xff] }
 0x1eb   : > { %969 = vadd.xlane.f32.xlu1 %v941_v37  ;;  %975 = vadd.xlane.f32.xlu0 %v944_v38 }
 0x1ef   : > { %993 = vadd.xlane.f32.xlu1 %v953_v39  ;;  %999 = vadd.xlane.f32.xlu0 %v956_v40 }
 0x1f3   : > { %971 = vadd.xlane.f32.xlu0 %v942_v41  ;;  %836 = vadd.xlane.f32.xlu1 %v1268_v21  ;;  %v796_v41 = vld [vmem:[%s1538_s8 + $0x20] sm:$0xff] }
 0x1f7   : > { %995 = vadd.xlane.f32.xlu0 %v954_v42  ;;  %860 = vadd.xlane.f32.xlu1 %v1280_v22  ;;  %v799_v42 = vld [vmem:[%s1538_s8 + $0x38] sm:$0xff] }
 0x1fb   : > { %832 = vadd.xlane.f32.xlu1 %v729_v23  ;;  %838 = vadd.xlane.f32.xlu0 %v1269_v25  ;;  %v928_v23 = vld [vmem:[%s1543_s12 + $0x78] sm:$0xff] }
 0x1ff   : > { %856 = vadd.xlane.f32.xlu1 %v777_v24  ;;  %862 = vadd.xlane.f32.xlu0 %v1281_v26  ;;  %v925_v24 = vld [vmem:[%s1543_s12 + $0x60] sm:$0xff] }
 0x203   : > { %981 = vadd.xlane.f32.xlu1 %v947_v43  ;;  %834 = vadd.xlane.f32.xlu0 %v732_v29  ;;  %v914_v29 = vld [vmem:[%s1543_s12 + $0x8] sm:$0xff] }
 0x207   : > { %977 = vadd.xlane.f32.xlu1 %v945_v44  ;;  %858 = vadd.xlane.f32.xlu0 %v780_v30  ;;  %v798_v30 = vld [vmem:[%s1538_s8 + $0x30] sm:$0xff] }
 0x20b   : > { %1001 = vadd.xlane.f32.xlu1 %v957_v45  ;;  %983 = vadd.xlane.f32.xlu0 %v948_v46 }
 0x20f   : > { %1005 = vadd.xlane.f32.xlu1 %v959_v48  ;;  %979 = vadd.xlane.f32.xlu0 %v946_v47  ;;  %v808_v47 = vld [vmem:[%s1538_s8 + $0x80] sm:$0xff]  ;;  %v811_v48 = vld [vmem:[%s1538_s8 + $0x98] sm:$0xff] }
 0x213   : > { %1003 = vadd.xlane.f32.xlu0 %v958_v49 }
 0x217   : > { %1007 = vadd.xlane.f32.xlu0 %v960_v50 }
 0x244   : > { %v845_v53 = vpop.xlane.xlu1 %844  ;;  %v821_v54 = vpop.xlane.xlu0 %820 }
 0x245   : > { %v878_v55 = vadd.f32 %v845_v53, %v806_v51  ;;  %v866_v56 = vadd.f32 %v821_v54, %v794_v52  ;;  %v919_v53 = vld [vmem:[%s1543_s12 + $0x30] sm:$0xff]  ;;  %v797_v54 = vld [vmem:[%s1538_s8 + $0x28] sm:$0xff] }
 0x247   : > { %903 = vst.msk [vmem:[%s1538_s8 + $0x70] sm:$0xff] %vm888_vm4, %v878_v55  ;;  %891 = vst.msk [vmem:[%s1538_s8 + $0x10] sm:$0xff] %vm888_vm4, %v866_v56 }
 0x248   : > { %v841_v59 = vpop.xlane.xlu1 %840  ;;  %v817_v60 = vpop.xlane.xlu0 %816 }
 0x249   : > { %v876_v61 = vadd.f32 %v841_v59, %v804_v57  ;;  %v864_v62 = vadd.f32 %v817_v60, %v792_v58  ;;  %v931_v59 = vld [vmem:[%s1543_s12 + $0x90] sm:$0xff]  ;;  %v809_v60 = vld [vmem:[%s1538_s8 + $0x88] sm:$0xff] }
 0x24b   : > { %901 = vst.msk [vmem:[%s1538_s8 + $0x60] sm:$0xff] %vm888_vm4, %v876_v61  ;;  %889 = vst.msk [vmem:[%s1538_s8] sm:$0xff] %vm888_vm4, %v864_v62 }
 0x24c   : > { %v966_v1 = vpop.xlane.xlu1 %965  ;;  %v823_v2 = vpop.xlane.xlu0 %822 }
 0x24d   : > { %v1011_v3 = vadd.f32 %v966_v1, %v915_v63  ;;  %v867_v4 = vadd.f32 %v823_v2, %v795_v0  ;;  %v917_v1 = vld [vmem:[%s1543_s12 + $0x20] sm:$0xff]  ;;  %v920_v2 = vld [vmem:[%s1543_s12 + $0x38] sm:$0xff] }
 0x24f   : > { %1035 = vst.msk [vmem:[%s1543_s12 + $0x10] sm:$0xff] %vm888_vm4, %v1011_v3  ;;  %892 = vst.msk [vmem:[%s1538_s8 + $0x18] sm:$0xff] %vm888_vm4, %v867_v4 }
 0x250   : > { %v990_v7 = vpop.xlane.xlu1 %989  ;;  %v847_v8 = vpop.xlane.xlu0 %846 }
 0x251   : > { %v1023_v9 = vadd.f32 %v990_v7, %v927_v5  ;;  %v879_v10 = vadd.f32 %v847_v8, %v807_v6  ;;  %v929_v7 = vld [vmem:[%s1543_s12 + $0x80] sm:$0xff]  ;;  %v932_v8 = vld [vmem:[%s1543_s12 + $0x98] sm:$0xff] }
 0x253   : > { %1047 = vst.msk [vmem:[%s1543_s12 + $0x70] sm:$0xff] %vm888_vm4, %v1023_v9  ;;  %904 = vst.msk [vmem:[%s1538_s8 + $0x78] sm:$0xff] %vm888_vm4, %v879_v10 }
 0x254   : > { %v843_v13 = vpop.xlane.xlu0 %842  ;;  %v819_v14 = vpop.xlane.xlu1 %818 }
 0x255   : > { %v877_v15 = vadd.f32 %v843_v13, %v805_v11  ;;  %v865_v16 = vadd.f32 %v819_v14, %v793_v12  ;;  %v918_v13 = vld [vmem:[%s1543_s12 + $0x28] sm:$0xff]  ;;  %v802_v14 = vld [vmem:[%s1538_s8 + $0x50] sm:$0xff] }
 0x257   : > { %902 = vst.msk [vmem:[%s1538_s8 + $0x68] sm:$0xff] %vm888_vm4, %v877_v15  ;;  %890 = vst.msk [vmem:[%s1538_s8 + $0x8] sm:$0xff] %vm888_vm4, %v865_v16 }
 0x258   : > { %v968_v19 = vpop.xlane.xlu0 %967  ;;  %v962_v20 = vpop.xlane.xlu1 %961 }
 0x259   : > { %v1012_v21 = vadd.f32 %v968_v19, %v916_v17  ;;  %v1009_v22 = vadd.f32 %v962_v20, %v913_v18  ;;  %v930_v19 = vld [vmem:[%s1543_s12 + $0x88] sm:$0xff]  ;;  %v814_v20 = vld [vmem:[%s1538_s8 + $0xb0] sm:$0xff] }
 0x25b   : > { %1036 = vst.msk [vmem:[%s1543_s12 + $0x18] sm:$0xff] %vm888_vm4, %v1012_v21  ;;  %1033 = vst.msk [vmem:[%s1543_s12] sm:$0xff] %vm888_vm4, %v1009_v22 }
 0x25c   : > { %v992_v25 = vpop.xlane.xlu0 %991  ;;  %v986_v26 = vpop.xlane.xlu1 %985 }
 0x25d   : > { %v1024_v27 = vadd.f32 %v992_v25, %v928_v23  ;;  %v1021_v28 = vadd.f32 %v986_v26, %v925_v24  ;;  %v800_v25 = vld [vmem:[%s1538_s8 + $0x40] sm:$0xff]  ;;  %v803_v26 = vld [vmem:[%s1538_s8 + $0x58] sm:$0xff] }
 0x25f   : > { %1048 = vst.msk [vmem:[%s1543_s12 + $0x78] sm:$0xff] %vm888_vm4, %v1024_v27  ;;  %1045 = vst.msk [vmem:[%s1543_s12 + $0x60] sm:$0xff] %vm888_vm4, %v1021_v28 }
 0x260   : > { %v964_v31 = vpop.xlane.xlu0 %963  ;;  %v829_v32 = vpop.xlane.xlu1 %828 }
 0x261   : > { %v1010_v33 = vadd.f32 %v964_v31, %v914_v29  ;;  %v870_v34 = vadd.f32 %v829_v32, %v798_v30  ;;  %v812_v31 = vld [vmem:[%s1538_s8 + $0xa0] sm:$0xff]  ;;  %v815_v32 = vld [vmem:[%s1538_s8 + $0xb8] sm:$0xff] }
 0x263   : > { %1034 = vst.msk [vmem:[%s1543_s12 + $0x8] sm:$0xff] %vm888_vm4, %v1010_v33  ;;  %895 = vst.msk [vmem:[%s1538_s8 + $0x30] sm:$0xff] %vm888_vm4, %v870_v34 }
 0x264   : > { %v988_v37 = vpop.xlane.xlu0 %987  ;;  %v853_v38 = vpop.xlane.xlu1 %852 }
 0x265   : > { %v1022_v39 = vadd.f32 %v988_v37, %v926_v35  ;;  %v882_v40 = vadd.f32 %v853_v38, %v810_v36  ;;  %v923_v37 = vld [vmem:[%s1543_s12 + $0x50] sm:$0xff]  ;;  %v801_v38 = vld [vmem:[%s1538_s8 + $0x48] sm:$0xff] }
 0x267   : > { %1046 = vst.msk [vmem:[%s1543_s12 + $0x68] sm:$0xff] %vm888_vm4, %v1022_v39  ;;  %907 = vst.msk [vmem:[%s1538_s8 + $0x90] sm:$0xff] %vm888_vm4, %v882_v40 }
 0x268   : > { %v825_v43 = vpop.xlane.xlu1 %824  ;;  %v831_v44 = vpop.xlane.xlu0 %830 }
 0x269   : > { %v868_v45 = vadd.f32 %v825_v43, %v796_v41  ;;  %v871_v46 = vadd.f32 %v831_v44, %v799_v42  ;;  %v921_v43 = vld [vmem:[%s1543_s12 + $0x40] sm:$0xff]  ;;  %v813_v44 = vld [vmem:[%s1538_s8 + $0xa8] sm:$0xff] }
 0x26b   : > { %893 = vst.msk [vmem:[%s1538_s8 + $0x20] sm:$0xff] %vm888_vm4, %v868_v45  ;;  %896 = vst.msk [vmem:[%s1538_s8 + $0x38] sm:$0xff] %vm888_vm4, %v871_v46 }
 0x26c   : > { %v849_v49 = vpop.xlane.xlu1 %848  ;;  %v855_v50 = vpop.xlane.xlu0 %854 }
 0x26d   : > { %v880_v51 = vadd.f32 %v849_v49, %v808_v47  ;;  %v883_v52 = vadd.f32 %v855_v50, %v811_v48  ;;  %v933_v49 = vld [vmem:[%s1543_s12 + $0xa0] sm:$0xff]  ;;  %v924_v50 = vld [vmem:[%s1543_s12 + $0x58] sm:$0xff] }
 0x26f   : > { %905 = vst.msk [vmem:[%s1538_s8 + $0x80] sm:$0xff] %vm888_vm4, %v880_v51  ;;  %908 = vst.msk [vmem:[%s1538_s8 + $0x98] sm:$0xff] %vm888_vm4, %v883_v52 }
 0x270   : > { %v974_v55 = vpop.xlane.xlu1 %973  ;;  %v827_v56 = vpop.xlane.xlu0 %826 }
 0x271   : > { %v1015_v57 = vadd.f32 %v974_v55, %v919_v53  ;;  %v869_v58 = vadd.f32 %v827_v56, %v797_v54  ;;  %v935_v55 = vld [vmem:[%s1543_s12 + $0xb0] sm:$0xff]  ;;  %v922_v56 = vld [vmem:[%s1543_s12 + $0x48] sm:$0xff] }
 0x273   : > { %1039 = vst.msk [vmem:[%s1543_s12 + $0x30] sm:$0xff] %vm888_vm4, %v1015_v57  ;;  %894 = vst.msk [vmem:[%s1538_s8 + $0x28] sm:$0xff] %vm888_vm4, %v869_v58 }
 0x274   : > { %v998_v61 = vpop.xlane.xlu1 %997  ;;  %v851_v62 = vpop.xlane.xlu0 %850 }
 0x275   : > { %v1027_v63 = vadd.f32 %v998_v61, %v931_v59  ;;  %v881_v0 = vadd.f32 %v851_v62, %v809_v60  ;;  %v934_v61 = vld [vmem:[%s1543_s12 + $0xa8] sm:$0xff] }
 0x277   : > { %1051 = vst.msk [vmem:[%s1543_s12 + $0x90] sm:$0xff] %vm888_vm4, %v1027_v63  ;;  %906 = vst.msk [vmem:[%s1538_s8 + $0x88] sm:$0xff] %vm888_vm4, %v881_v0  ;;  %v936_v0 = vld [vmem:[%s1543_s12 + $0xb8] sm:$0xff] }
 0x278   : > { %v970_v3 = vpop.xlane.xlu1 %969  ;;  %v976_v4 = vpop.xlane.xlu0 %975 }
 0x279   : > { %v1013_v5 = vadd.f32 %v970_v3, %v917_v1  ;;  %v1016_v6 = vadd.f32 %v976_v4, %v920_v2 }
 0x27b   : > { %1037 = vst.msk [vmem:[%s1543_s12 + $0x20] sm:$0xff] %vm888_vm4, %v1013_v5  ;;  %1040 = vst.msk [vmem:[%s1543_s12 + $0x38] sm:$0xff] %vm888_vm4, %v1016_v6 }
 0x27c   : > { %v994_v9 = vpop.xlane.xlu1 %993  ;;  %v1000_v10 = vpop.xlane.xlu0 %999 }
 0x27d   : > { %v1025_v11 = vadd.f32 %v994_v9, %v929_v7  ;;  %v1028_v12 = vadd.f32 %v1000_v10, %v932_v8 }
 0x27f   : > { %1049 = vst.msk [vmem:[%s1543_s12 + $0x80] sm:$0xff] %vm888_vm4, %v1025_v11  ;;  %1052 = vst.msk [vmem:[%s1543_s12 + $0x98] sm:$0xff] %vm888_vm4, %v1028_v12 }
 0x280   : > { %v972_v15 = vpop.xlane.xlu0 %971  ;;  %v837_v16 = vpop.xlane.xlu1 %836 }
 0x281   : > { %v1014_v17 = vadd.f32 %v972_v15, %v918_v13  ;;  %v874_v18 = vadd.f32 %v837_v16, %v802_v14 }
 0x283   : > { %1038 = vst.msk [vmem:[%s1543_s12 + $0x28] sm:$0xff] %vm888_vm4, %v1014_v17  ;;  %899 = vst.msk [vmem:[%s1538_s8 + $0x50] sm:$0xff] %vm888_vm4, %v874_v18 }
 0x284   : > { %v996_v21 = vpop.xlane.xlu0 %995  ;;  %v861_v22 = vpop.xlane.xlu1 %860 }
 0x285   : > { %v1026_v23 = vadd.f32 %v996_v21, %v930_v19  ;;  %v886_v24 = vadd.f32 %v861_v22, %v814_v20 }
 0x287   : > { %1050 = vst.msk [vmem:[%s1543_s12 + $0x88] sm:$0xff] %vm888_vm4, %v1026_v23  ;;  %911 = vst.msk [vmem:[%s1538_s8 + $0xb0] sm:$0xff] %vm888_vm4, %v886_v24 }
 0x288   : > { %v833_v27 = vpop.xlane.xlu1 %832  ;;  %v839_v28 = vpop.xlane.xlu0 %838 }
 0x289   : > { %v872_v29 = vadd.f32 %v833_v27, %v800_v25  ;;  %v875_v30 = vadd.f32 %v839_v28, %v803_v26 }
 0x28b   : > { %897 = vst.msk [vmem:[%s1538_s8 + $0x40] sm:$0xff] %vm888_vm4, %v872_v29  ;;  %900 = vst.msk [vmem:[%s1538_s8 + $0x58] sm:$0xff] %vm888_vm4, %v875_v30 }
 0x28c   : > { %v857_v33 = vpop.xlane.xlu1 %856  ;;  %v863_v34 = vpop.xlane.xlu0 %862 }
 0x28d   : > { %v884_v35 = vadd.f32 %v857_v33, %v812_v31  ;;  %v887_v36 = vadd.f32 %v863_v34, %v815_v32 }
 0x28f   : > { %909 = vst.msk [vmem:[%s1538_s8 + $0xa0] sm:$0xff] %vm888_vm4, %v884_v35  ;;  %912 = vst.msk [vmem:[%s1538_s8 + $0xb8] sm:$0xff] %vm888_vm4, %v887_v36 }
 0x290   : > { %v982_v39 = vpop.xlane.xlu1 %981  ;;  %v835_v40 = vpop.xlane.xlu0 %834 }
 0x291   : > { %v1019_v41 = vadd.f32 %v982_v39, %v923_v37  ;;  %v873_v42 = vadd.f32 %v835_v40, %v801_v38 }
 0x293   : > { %1043 = vst.msk [vmem:[%s1543_s12 + $0x50] sm:$0xff] %vm888_vm4, %v1019_v41  ;;  %898 = vst.msk [vmem:[%s1538_s8 + $0x48] sm:$0xff] %vm888_vm4, %v873_v42 }
 0x294   : > { %v978_v45 = vpop.xlane.xlu1 %977  ;;  %v859_v46 = vpop.xlane.xlu0 %858 }
 0x295   : > { %v1017_v47 = vadd.f32 %v978_v45, %v921_v43  ;;  %v885_v48 = vadd.f32 %v859_v46, %v813_v44 }
 0x297   : > { %1041 = vst.msk [vmem:[%s1543_s12 + $0x40] sm:$0xff] %vm888_vm4, %v1017_v47  ;;  %910 = vst.msk [vmem:[%s1538_s8 + $0xa8] sm:$0xff] %vm888_vm4, %v885_v48 }
 0x298   : > { %v1002_v51 = vpop.xlane.xlu1 %1001  ;;  %v984_v52 = vpop.xlane.xlu0 %983 }
 0x299   : > { %v1029_v53 = vadd.f32 %v1002_v51, %v933_v49  ;;  %v1020_v54 = vadd.f32 %v984_v52, %v924_v50 }
 0x29b   : > { %1053 = vst.msk [vmem:[%s1543_s12 + $0xa0] sm:$0xff] %vm888_vm4, %v1029_v53  ;;  %1044 = vst.msk [vmem:[%s1543_s12 + $0x58] sm:$0xff] %vm888_vm4, %v1020_v54 }
 0x29c   : > { %v1006_v57 = vpop.xlane.xlu1 %1005  ;;  %v980_v58 = vpop.xlane.xlu0 %979 }
 0x29d   : > { %v1031_v59 = vadd.f32 %v1006_v57, %v935_v55  ;;  %v1018_v60 = vadd.f32 %v980_v58, %v922_v56 }
 0x29f   : > { %1055 = vst.msk [vmem:[%s1543_s12 + $0xb0] sm:$0xff] %vm888_vm4, %v1031_v59  ;;  %1042 = vst.msk [vmem:[%s1543_s12 + $0x48] sm:$0xff] %vm888_vm4, %v1018_v60 }
 0x2a0   : > { %v1004_v62 = vpop.xlane.xlu0 %1003 }
 0x2a1   : > { %v1030_v63 = vadd.f32 %v1004_v62, %v934_v61 }
 0x2a3   : > { %1054 = vst.msk [vmem:[%s1543_s12 + $0xa8] sm:$0xff] %vm888_vm4, %v1030_v63 }
 0x2a4   : > { %v1008_v1 = vpop.xlane.xlu0 %1007 }
 0x2a5   : > { %v1032_v2 = vadd.f32 %v1008_v1, %v936_v0 }
 0x2a7   : > { %1056 = vst.msk [vmem:[%s1543_s12 + $0xb8] sm:$0xff] %vm888_vm4, %v1032_v2 }
 0x2a8 PF: > { %s17_s27 = sadd.s32 1, %s1415_s27   ;;  %s1921_s21 = smov %s1395_s22 }
 0x2a9   : > { %p14_p12 = scmp.ge.s32.totalorder %s17_s27, 16   ;;  %s1922_s22 = smov %s1509_s11 }
 0x2aa   : > { %s1923_s23 = smov %s1407_s25  ;;  %s1924_s24 = smov %s1411_s26 }
 0x2ab   : > { %s1925_s25 = smov %s1928_s28  ;;  %s1926_s26 = smov %s1932_s29 }
 0x2ac   :  { %16 = sbr.rel (!%p14_p12) target bundleno = 4 (0x4), region = 178 }

// kernel: fused_forward.5
= control target key start
LH: loop header
LB: loop body
LE: loop exit
PB: predicated region body
PF: predicated region fallthrough
CT: control target
= control target key end

     0   :  { %s1591_s24 = smov 0   ;;  %s1593_s25 = smov 0   ;;  %s2070_s0 = inlined_call_operand.vmem [shape: bf16[2,32,896], index: 0, kind: input, shape index: {}]   ;;  %s2071_s1 = inlined_call_operand.vmem [shape: f32[2,32,896], index: 1, kind: input, shape index: {}]   ;;  %s2072_s2 = inlined_call_operand.vmem [shape: f32[32,1], index: 2, kind: input, shape index: {}]   ;;  %s2073_s3 = inlined_call_operand.vmem [shape: f32[32,1], index: 3, kind: input, shape index: {}]   ;;  %s2074_s4 = inlined_call_operand.vmem [shape: bf16[192,32], index: 4, kind: input, shape index: {}]   ;;  %s2075_s5 = inlined_call_operand.vmem [shape: f32[192,1], index: 5, kind: input, shape index: {}]   ;;  %s2076_s6 = inlined_call_operand.vmem [shape: f32[192,1], index: 6, kind: input, shape index: {}]   ;;  %s2077_s7 = inlined_call_operand.vmem [shape: f32[2,192,896], index: 7, kind: output, shape index: {}]  }
   0x1   :  { %s1595_s26 = smov 0   ;;  %s1597_s27 = smov 0  }
   0x2   :  { %s1599_s28 = smov 0   ;;  %s1601_s29 = smov 0  }
   0x3   :  { %s1603_s30 = smov 0  }
   0x4 LB: > { %s26_s8 = sadd.s32 1, %s1540_s28  ;;  %s29_s9 = sadd.s32 1, %s1544_s29  ;;  %s1548_s30 = sphi %s1603_s30, %s17_s30   ;;  %s1544_s29 = sphi %s1601_s29, %s2085_s29   ;;  %s1540_s28 = sphi %s1599_s28, %s2084_s28   ;;  %s1536_s27 = sphi %s1597_s27, %s2083_s27   ;;  %s1532_s26 = sphi %s1595_s26, %s2082_s26   ;;  %s1528_s25 = sphi %s1593_s25, %s2081_s25   ;;  %s1524_s24 = sphi %s1591_s24, %s2080_s24  }
   0x5   : > { %p27_p0 = scmp.ge.s32.totalorder %s26_s8, 7  ;;  %s1326_s10 = sadd.s32 4294967295, %s1548_s30  }
   0x6   : > { %p45_p1 = scmp.ne.s32.totalorder %s1528_s25, %s1524_s24  ;;  %p46_p2 = scmp.eq.s32.totalorder %s1548_s30, 0 }
   0x7   : > { %s2087_s8 = smov (%p27_p0, %s26_s8), 0  ;;  %s2089_s9 = smov (!%p27_p0, %s29_s9), %s1544_s29 }
   0x8   : > { %p31_p3 = scmp.ge.s32.totalorder %s2089_s9, 2  ;;  %p210_p4 = scmp.eq.s32.totalorder %s1326_s10, 13 }
   0x9   : > { %s34_s11 = ssub.s32 %s1540_s28, %s2087_s8  ;;  %p1637_p5 = por %p46_p2, %p45_p1 }
   0xa   : > { %s2091_s9 = smov (%p31_p3, %s2089_s9), 0  ;;  %p1643_p6 = por %p210_p4, %p45_p1 }
   0xb   : > { %s33_s14 = ssub.s32 %s1544_s29, %s2091_s9  ;;  %s38_s16 = sadd.s32 1, %s1528_s25 }
   0xc   : > { %s35_s15 = sor.u32 %s34_s11, %s33_s14  ;;  %p1329_p8 = scmp.ge.s32.totalorder %s1548_s30, 14 }
   0xd   : > { %p36_p7 = scmp.eq.s32.totalorder %s35_s15, 0 }
   0xe   : > { %247 = sbr.rel (%p1329_p8) target bundleno = 39 (0x27), region = 36 }
   0xf   : > { %s1651_s17 = scalar_select %p36_p7, %s1528_s25, %s38_s16  }
  0x15   : > { %250 = sbr.rel (!%p1637_p5) target bundleno = 30 (0x1e), region = 40  ;;  %s252_s18 = sand.u32 (%p1637_p5), 1, %s1528_s25  }
  0x16   : > { %s1419_s19 = smul.u32 (%p1637_p5), 28, %s1544_s29  ;;  %s1330_s20 = sshll.u32 (%p1637_p5), %s252_s18, 4 }
  0x17   : > { %s254_s14 = scalar_lea.vmem (%p1637_p5), [#allocation2], %s1330_s20 }
  0x18   : > { %s256_s21 = sadd.s32 (%p1637_p5), %s1540_s28, %s1419_s19 }
  0x19   : > { %s1331_s22 = sshll.u32 (%p1637_p5), %s256_s21, 2 }
  0x1a   : > { %s258_s11 = scalar_lea.vmem (%p1637_p5), %s2070_s0, %s1331_s22 }
  0x1b   : > { %v274_v0 = vld [vmem:[%s258_s11] sm:$0xf] (%p1637_p5)  ;;  %v276_v1 = vld [vmem:[%s258_s11 + $0x1c] sm:$0xf] (%p1637_p5)  ;;  %v278_v2 = vld [vmem:[%s258_s11 + $0x38] sm:$0xf] (%p1637_p5) }
  0x1c   : > { %275 = vst [vmem:[%s254_s14] sm:$0xf] %v274_v0  ;;  %277 = vst [vmem:[%s254_s14 + $0x4] sm:$0xf] %v276_v1  ;;  %v280_v3 = vld [vmem:[%s258_s11 + $0x54] sm:$0xf] }
  0x1d   : > { %279 = vst [vmem:[%s254_s14 + $0x8] sm:$0xf] %v278_v2  ;;  %281 = vst [vmem:[%s254_s14 + $0xc] sm:$0xf] %v280_v3 }
  0x1e PF: > { %312 = sbr.rel (!%p1637_p5) target bundleno = 39 (0x27), region = 81  ;;  %s314_s15 = sand.u32 (%p1637_p5), 1, %s1528_s25  }
  0x1f   : > { %s1420_s16 = smul.u32 (%p1637_p5), 28, %s1544_s29  ;;  %s1332_s18 = sshll.u32 (%p1637_p5), %s314_s15, 5 }
  0x20   : > { %s316_s10 = scalar_lea.vmem (%p1637_p5), [#allocation3], %s1332_s18 }
  0x21   : > { %s318_s19 = sadd.s32 (%p1637_p5), %s1540_s28, %s1420_s16 }
  0x22   : > { %s1333_s21 = sshll.u32 (%p1637_p5), %s318_s19, 3 }
  0x23   : > { %s320_s20 = scalar_lea.vmem (%p1637_p5), %s2071_s1, %s1333_s21 }
  0x24   : > { %v354_v4 = vld [vmem:[%s320_s20] sm:$0xff] (%p1637_p5)  ;;  %v356_v5 = vld [vmem:[%s320_s20 + $0x38] sm:$0xff] (%p1637_p5)  ;;  %v358_v6 = vld [vmem:[%s320_s20 + $0x70] sm:$0xff] (%p1637_p5) }
  0x25   : > { %355 = vst [vmem:[%s316_s10] sm:$0xff] %v354_v4  ;;  %357 = vst [vmem:[%s316_s10 + $0x8] sm:$0xff] %v356_v5  ;;  %v360_v7 = vld [vmem:[%s320_s20 + $0xa8] sm:$0xff] }
  0x26   : > { %359 = vst [vmem:[%s316_s10 + $0x10] sm:$0xff] %v358_v6  ;;  %361 = vst [vmem:[%s316_s10 + $0x18] sm:$0xff] %v360_v7 }
  0x27 PF: > { %p1334_p9 = scmp.ge.s32.totalorder %s1548_s30, 1  ;;  %p366_p10 = scmp.lt.s32.totalorder %s1548_s30, 15 }
  0x29   : > { %p367_p11 = pnand %p1334_p9, %p366_p10 }
  0x2a   : > { %v451_v8 = vld [vmem:[%s2073_s3] sm:$0xff] (!%p367_p11)  ;;  %v1550_v10 = vmov (!%p367_p11), 0   ;;  %v452_v11 = vld [vmem:[%s2073_s3 + $0x8] sm:$0xff] (!%p367_p11)  ;;  %v426_v13 = vld [vmem:[%s2072_s2 + $0x18] sm:$0xff] (!%p367_p11)  ;;  %vm573_vm0 = vcmask (!%p367_p11), 261120   ;;  %s1849_s22 = sand.u32 (!%p367_p11), 1, %s1524_s24  }
  0x2b   : > { %370 = sbr.rel (%p367_p11) target bundleno = 441 (0x1b9), region = 119  ;;  %v423_v9 = vld [vmem:[%s2072_s2] sm:$0xff] (!%p367_p11)  ;;  %1481 = vset.pattern.permute.xlu1 (!%p367_p11), %v1550_v10  ;;  %1480 = vset.pattern.permute.xlu0 (!%p367_p11), %v1550_v10  ;;  %v424_v12 = vld [vmem:[%s2072_s2 + $0x8] sm:$0xff] (!%p367_p11)  ;;  %v425_v14 = vld [vmem:[%s2072_s2 + $0x10] sm:$0xff] (!%p367_p11)  ;;  %s1335_s23 = sshll.u32 (!%p367_p11), %s1849_s22, 4 }
  0x2c   : > { %457 = vperm.xlu1 (!%p367_p11), %1481, %v451_v8   ;;  %429 = vperm.xlu0 (!%p367_p11), %1480, %v423_v9   ;;  %v454_v15 = vld [vmem:[%s2073_s3 + $0x18] sm:$0xff] (!%p367_p11)  ;;  %v453_v16 = vld [vmem:[%s2073_s3 + $0x10] sm:$0xff] (!%p367_p11)  ;;  %v740_v17 = vld [vmem:[%s2075_s5 + $0x8] sm:$0xff] (!%p367_p11)  ;;  %s375_s20 = scalar_lea.vmem (!%p367_p11), [#allocation2], %s1335_s23  ;;  %s1336_s10 = sshll.u32 (!%p367_p11), %s1849_s22, 5 }
  0x2d   : > { %v739_v18 = vld [vmem:[%s2075_s5] sm:$0xff] (!%p367_p11)  ;;  %v742_v19 = vld [vmem:[%s2075_s5 + $0x18] sm:$0xff] (!%p367_p11)  ;;  %v741_v20 = vld [vmem:[%s2075_s5 + $0x10] sm:$0xff] (!%p367_p11)  ;;  %s382_s12 = scalar_lea.vmem (!%p367_p11), [#allocation3], %s1336_s10  ;;  %s1421_s23 = smul.u32 (!%p367_p11), 192, %s1849_s22 }
  0x2e   : > { %v744_v21 = vld [vmem:[%s2075_s5 + $0x28] sm:$0xff] (!%p367_p11)  ;;  %v1482_v22 = vld [vmem:[%s2074_s4] sm:$0xff] (!%p367_p11)   ;;  %v1483_v23 = vld [vmem:[%s2074_s4 + $0x30] sm:$0xff] (!%p367_p11)  }
  0x2f   : > { %v743_v24 = vld [vmem:[%s2075_s5 + $0x20] sm:$0xff] (!%p367_p11)  ;;  %1391 = vmatprep.mubr.msk.bf16.mxu0 (!%p367_p11), %vm573_vm0, %v1482_v22  ;;  %1403 = vmatprep.mubr.msk.bf16.mxu1 (!%p367_p11), %vm573_vm0, %v1483_v23  ;;  %v746_v25 = vld [vmem:[%s2075_s5 + $0x38] sm:$0xff] (!%p367_p11)  ;;  %v745_v26 = vld [vmem:[%s2075_s5 + $0x30] sm:$0xff] (!%p367_p11)  ;;  %s1942_s22 = scalar_lea.vmem (!%p367_p11), [#allocation4], %s1421_s23 }
  0x30   : > { %462 = vperm.xlu1 (!%p367_p11), %1481, %v452_v11   ;;  %434 = vperm.xlu0 (!%p367_p11), %1480, %v424_v12   ;;  %v748_v27 = vld [vmem:[%s2075_s5 + $0x48] sm:$0xff] (!%p367_p11)  ;;  %v747_v28 = vld [vmem:[%s2075_s5 + $0x40] sm:$0xff] (!%p367_p11)  ;;  %v750_v29 = vld [vmem:[%s2075_s5 + $0x58] sm:$0xff] (!%p367_p11) }
  0x31   : > { %v749_v30 = vld [vmem:[%s2075_s5 + $0x50] sm:$0xff] (!%p367_p11)  ;;  %v752_v31 = vld [vmem:[%s2075_s5 + $0x68] sm:$0xff] (!%p367_p11)  ;;  %v751_v32 = vld [vmem:[%s2075_s5 + $0x60] sm:$0xff] (!%p367_p11) }
  0x32   : > { %v754_v33 = vld [vmem:[%s2075_s5 + $0x78] sm:$0xff]  ;;  %v753_v34 = vld [vmem:[%s2075_s5 + $0x70] sm:$0xff]  ;;  %v756_v35 = vld [vmem:[%s2075_s5 + $0x88] sm:$0xff] }
  0x33   : > { %v755_v36 = vld [vmem:[%s2075_s5 + $0x80] sm:$0xff]  ;;  %v758_v37 = vld [vmem:[%s2075_s5 + $0x98] sm:$0xff]  ;;  %v757_v38 = vld [vmem:[%s2075_s5 + $0x90] sm:$0xff] }
  0x34   : > { %444 = vperm.xlu1 %1481, %v426_v13   ;;  %439 = vperm.xlu0 %1480, %v425_v14   ;;  %v760_v39 = vld [vmem:[%s2075_s5 + $0xa8] sm:$0xff]  ;;  %v759_v40 = vld [vmem:[%s2075_s5 + $0xa0] sm:$0xff]  ;;  %v762_v41 = vld [vmem:[%s2075_s5 + $0xb8] sm:$0xff] }
  0x35   : > { %v761_v42 = vld [vmem:[%s2075_s5 + $0xb0] sm:$0xff]  ;;  %v908_v43 = vld [vmem:[%s2076_s6 + $0x8] sm:$0xff]  ;;  %v907_v44 = vld [vmem:[%s2076_s6] sm:$0xff] }
  0x36   : > { %v910_v45 = vld [vmem:[%s2076_s6 + $0x18] sm:$0xff]  ;;  %v909_v46 = vld [vmem:[%s2076_s6 + $0x10] sm:$0xff]  ;;  %v912_v47 = vld [vmem:[%s2076_s6 + $0x28] sm:$0xff] }
  0x37   : > { %v911_v48 = vld [vmem:[%s2076_s6 + $0x20] sm:$0xff]  ;;  %v914_v49 = vld [vmem:[%s2076_s6 + $0x38] sm:$0xff]  ;;  %v913_v50 = vld [vmem:[%s2076_s6 + $0x30] sm:$0xff] }
  0x38   : > { %472 = vperm.xlu1 %1481, %v454_v15   ;;  %467 = vperm.xlu0 %1480, %v453_v16   ;;  %v916_v51 = vld [vmem:[%s2076_s6 + $0x48] sm:$0xff]  ;;  %v915_v52 = vld [vmem:[%s2076_s6 + $0x40] sm:$0xff]  ;;  %v918_v53 = vld [vmem:[%s2076_s6 + $0x58] sm:$0xff] }
  0x39   : > { %v917_v54 = vld [vmem:[%s2076_s6 + $0x50] sm:$0xff]  ;;  %v920_v55 = vld [vmem:[%s2076_s6 + $0x68] sm:$0xff]  ;;  %v919_v56 = vld [vmem:[%s2076_s6 + $0x60] sm:$0xff] }
  0x3a   : > { %v922_v57 = vld [vmem:[%s2076_s6 + $0x78] sm:$0xff]  ;;  %v921_v58 = vld [vmem:[%s2076_s6 + $0x70] sm:$0xff]  ;;  %v924_v59 = vld [vmem:[%s2076_s6 + $0x88] sm:$0xff] }
  0x3b   : > { %v923_v60 = vld [vmem:[%s2076_s6 + $0x80] sm:$0xff]  ;;  %v926_v61 = vld [vmem:[%s2076_s6 + $0x98] sm:$0xff]  ;;  %v925_v62 = vld [vmem:[%s2076_s6 + $0x90] sm:$0xff] }
  0x3c   : > { %770 = vperm.xlu1 %1481, %v740_v17   ;;  %765 = vperm.xlu0 %1480, %v739_v18   ;;  %v928_v63 = vld [vmem:[%s2076_s6 + $0xa8] sm:$0xff]  ;;  %v927_v0 = vld [vmem:[%s2076_s6 + $0xa0] sm:$0xff]  ;;  %v930_v1 = vld [vmem:[%s2076_s6 + $0xb8] sm:$0xff] }
  0x3d   : > { %v929_v2 = vld [vmem:[%s2076_s6 + $0xb0] sm:$0xff]  ;;  %v1372_v11 = vld [vmem:[%s375_s20 + $0x8] sm:$0xff]   ;;  %v479_v14 = vld [vmem:[%s382_s12] sm:$0xff] }
  0x3e   : > { %v1365_v3 = vld [vmem:[%s375_s20] sm:$0xff]   ;;  %v480_v15 = vld [vmem:[%s382_s12 + $0x8] sm:$0xff]  ;;  %v1371_v17 = vunpack.c.h.bf16 %v1372_v11  ;;  %v1370_v18 = vunpack.c.l.bf16 %v1372_v11  ;;  %s1422_s20 = smul.u32 (%p1643_p6), 168, %s1536_s27 }
  0x3f   : > { %v1366_v4 = vunpack.c.l.bf16 %v1365_v3  ;;  %v1367_v8 = vunpack.c.h.bf16 %v1365_v3 }
  0x40   : > { %780 = vperm.xlu1 %1481, %v742_v19   ;;  %775 = vperm.xlu0 %1480, %v741_v20   ;;  %s1107_s13 = sadd.s32 (%p1643_p6), %s1532_s26, %s1422_s20 }
  0x41   : > { %s1361_s10 = sshll.u32 (%p1643_p6), %s1107_s13, 3 }
  0x42   : > { %s2011_s27 = scalar_lea.vmem (%p1643_p6), %s2077_s7, %s1361_s10 }
  0x44   : > { %790 = vperm.xlu1 %1481, %v744_v21   ;;  %785 = vperm.xlu0 %1480, %v743_v24  }
  0x48   : > { %800 = vperm.xlu1 %1481, %v746_v25   ;;  %795 = vperm.xlu0 %1480, %v745_v26  }
  0x4c   : > { %810 = vperm.xlu1 %1481, %v748_v27   ;;  %805 = vperm.xlu0 %1480, %v747_v28   ;;  %v482_v27 = vld [vmem:[%s382_s12 + $0x18] sm:$0xff] }
  0x50   : > { %820 = vperm.xlu1 %1481, %v750_v29   ;;  %815 = vperm.xlu0 %1480, %v749_v30   ;;  %v481_v29 = vld [vmem:[%s382_s12 + $0x10] sm:$0xff] }
  0x54   : > { %830 = vperm.xlu1 %1481, %v752_v31   ;;  %825 = vperm.xlu0 %1480, %v751_v32  }
  0x58   : > { %840 = vperm.xlu1 %1481, %v754_v33   ;;  %835 = vperm.xlu0 %1480, %v753_v34  }
  0x5c   : > { %850 = vperm.xlu1 %1481, %v756_v35   ;;  %845 = vperm.xlu0 %1480, %v755_v36   ;;  %v1484_v35 = vld [vmem:[%s2074_s4 + $0x8] sm:$0xff]   ;;  %v1485_v36 = vld [vmem:[%s2074_s4 + $0x38] sm:$0xff]  }
  0x60   : > { %860 = vperm.xlu1 %1481, %v758_v37   ;;  %855 = vperm.xlu0 %1480, %v757_v38   ;;  %v1486_v37 = vld [vmem:[%s2074_s4 + $0x10] sm:$0xff]   ;;  %v1487_v38 = vld [vmem:[%s2074_s4 + $0x40] sm:$0xff]  }
  0x64   : > { %870 = vperm.xlu1 %1481, %v760_v39   ;;  %865 = vperm.xlu0 %1480, %v759_v40   ;;  %v1488_v39 = vld [vmem:[%s2074_s4 + $0x18] sm:$0xff]   ;;  %v1489_v40 = vld [vmem:[%s2074_s4 + $0x48] sm:$0xff]  }
  0x68   : > { %880 = vperm.xlu1 %1481, %v762_v41   ;;  %875 = vperm.xlu0 %1480, %v761_v42   ;;  %v1490_v41 = vld [vmem:[%s2074_s4 + $0x20] sm:$0xff]   ;;  %v1491_v42 = vld [vmem:[%s2074_s4 + $0x50] sm:$0xff]  }
  0x6c   : > { %938 = vperm.xlu1 %1481, %v908_v43   ;;  %933 = vperm.xlu0 %1480, %v907_v44   ;;  %v1492_v43 = vld [vmem:[%s2074_s4 + $0x28] sm:$0xff]   ;;  %v1493_v44 = vld [vmem:[%s2074_s4 + $0x58] sm:$0xff]  }
  0x70   : > { %948 = vperm.xlu1 %1481, %v910_v45   ;;  %943 = vperm.xlu0 %1480, %v909_v46  }
  0x74   : > { %958 = vperm.xlu1 %1481, %v912_v47   ;;  %953 = vperm.xlu0 %1480, %v911_v48  }
  0x78   : > { %968 = vperm.xlu1 %1481, %v914_v49   ;;  %963 = vperm.xlu0 %1480, %v913_v50  }
  0x7c   : > { %978 = vperm.xlu1 %1481, %v916_v51   ;;  %973 = vperm.xlu0 %1480, %v915_v52  }
  0x80   : > { %988 = vperm.xlu1 %1481, %v918_v53   ;;  %983 = vperm.xlu0 %1480, %v917_v54  }
  0x84   : > { %998 = vperm.xlu1 %1481, %v920_v55   ;;  %993 = vperm.xlu0 %1480, %v919_v56  }
  0x88   : > { %1008 = vperm.xlu1 %1481, %v922_v57   ;;  %1003 = vperm.xlu0 %1480, %v921_v58  }
  0x8c   : > { %1018 = vperm.xlu1 %1481, %v924_v59   ;;  %1013 = vperm.xlu0 %1480, %v923_v60  }
  0x90   : > { %1028 = vperm.xlu1 %1481, %v926_v61   ;;  %1023 = vperm.xlu0 %1480, %v925_v62  }
  0x94   : > { %1038 = vperm.xlu1 %1481, %v928_v63   ;;  %1033 = vperm.xlu0 %1480, %v927_v0  }
  0x98   : > { %1048 = vperm.xlu1 %1481, %v930_v1   ;;  %1043 = vperm.xlu0 %1480, %v929_v2  }
  0xab   : > { %v458_v5 = vpop.permute.xlu1 %457  ;;  %v430_v6 = vpop.permute.xlu0 %429 }
  0xac   : > { %v447_v7 = vmul.f32 %v1366_v4, %v430_v6 }
  0xae   : > { %v475_v12 = vadd.f32 %v458_v5, %v447_v7 }
  0xaf   : > { %v463_v9 = vpop.permute.xlu1 %462  ;;  %v435_v10 = vpop.permute.xlu0 %434 }
  0xb0   : > { %v448_v13 = vmul.f32 %v1367_v8, %v435_v10  ;;  %v483_v21 = vadd.f32 %v479_v14, %v475_v12 }
  0xb2   : > { %v476_v16 = vadd.f32 %v463_v9, %v448_v13 }
  0xb3   : > { %v445_v19 = vpop.permute.xlu1 %444  ;;  %v440_v20 = vpop.permute.xlu0 %439 }
  0xb4   : > { %v484_v22 = vadd.f32 %v480_v15, %v476_v16  ;;  %v450_v24 = vmul.f32 %v1371_v17, %v445_v19  ;;  %v449_v25 = vmul.f32 %v1370_v18, %v440_v20 }
  0xb6   : > { %v511_v23 = vpack.c.bf16 %v484_v22, %v483_v21 }
  0xb7   : > { %v473_v26 = vpop.permute.xlu1 %472  ;;  %v468_v28 = vpop.permute.xlu0 %467 }
  0xb8   : > { %v478_v30 = vadd.f32 %v473_v26, %v450_v24  ;;  %v477_v31 = vadd.f32 %v468_v28, %v449_v25  ;;  %1387 = vmatprep.subr.bf16.mxu0 %v511_v23  ;;  %1415 = vmatprep.subr.bf16.mxu1 %v511_v23 }
  0xb9   : > { %1388 = vmatpush3.bf16.msra.mxu0 %v511_v23  ;;  %1417 = vmatpush3.bf16.msra.mxu1 %v511_v23 }
  0xba   : > { %v486_v32 = vadd.f32 %v482_v27, %v478_v30  ;;  %v485_v33 = vadd.f32 %v481_v29, %v477_v31 }
  0xbb   : > { %v766_v45 = vpop.permute.xlu0 %765  ;;  %v771_v46 = vpop.permute.xlu1 %770 }
  0xbc   : > { %v512_v34 = vpack.c.bf16 %v486_v32, %v485_v33 }
  0xbe   : > { %1389 = vmatprep.subr.bf16.mxu0 %v512_v34  ;;  %1416 = vmatprep.subr.bf16.mxu1 %v512_v34 }
  0xbf   : > { %1390 = vmatpush3.bf16.msra.mxu0 %v512_v34  ;;  %1418 = vmatpush3.bf16.msra.mxu1 %v512_v34  ;;  %v776_v47 = vpop.permute.xlu0 %775  ;;  %v781_v48 = vpop.permute.xlu1 %780 }
  0xc2   : > { %1392 = vmatmul.mubr.msk.bf16.vlgmr.msra.gmra.mrb[0].mxu0 %vm573_vm0, %v1484_v35  ;;  %1404 = vmatmul.mubr.msk.bf16.vlgmr.msra.gmra.mrb[0].mxu1 %vm573_vm0, %v1485_v36 }
  0xc3   : > { %1395 = vmatprep.mubr.msk.bf16.mxu0 %vm573_vm0, %v1486_v37  ;;  %1407 = vmatprep.mubr.msk.bf16.mxu1 %vm573_vm0, %v1487_v38  ;;  %v1893_v49 = vpop.permute.xlu0 %785  ;;  %v1895_v50 = vpop.permute.xlu1 %790 }
  0xc7   : > { %v1897_v51 = vpop.permute.xlu0 %795  ;;  %v1899_v52 = vpop.permute.xlu1 %800 }
  0xca   : > { %1396 = vmatmul.mubr.msk.bf16.gmra.mrb[4].mxu0 %vm573_vm0, %v1488_v39  ;;  %1408 = vmatmul.mubr.msk.bf16.gmra.mrb[4].mxu1 %vm573_vm0, %v1489_v40 }
  0xcb   : > { %1399 = vmatprep.mubr.msk.bf16.mxu0 %vm573_vm0, %v1490_v41  ;;  %1411 = vmatprep.mubr.msk.bf16.mxu1 %vm573_vm0, %v1491_v42  ;;  %v1901_v53 = vpop.permute.xlu0 %805  ;;  %v1903_v54 = vpop.permute.xlu1 %810 }
  0xcf   : > { %v1905_v55 = vpop.permute.xlu0 %815  ;;  %v1907_v56 = vpop.permute.xlu1 %820 }
  0xd2   : > { %1400 = vmatmul.mubr.msk.bf16.gmra.mrb[8].mxu0 %vm573_vm0, %v1492_v43  ;;  %1412 = vmatmul.mubr.msk.bf16.gmra.mrb[8].mxu1 %vm573_vm0, %v1493_v44 }
  0xd3   : > { %v826_v57 = vpop.permute.xlu0 %825  ;;  %v831_v58 = vpop.permute.xlu1 %830 }
  0xd7   : > { %v836_v59 = vpop.permute.xlu0 %835  ;;  %v841_v60 = vpop.permute.xlu1 %840 }
  0xdb   : > { %v1909_v61 = vpop.permute.xlu0 %845  ;;  %v1911_v62 = vpop.permute.xlu1 %850 }
  0xdf   : > { %v1913_v63 = vpop.permute.xlu0 %855  ;;  %v1915_v0 = vpop.permute.xlu1 %860 }
  0xe3   : > { %v1917_v1 = vpop.permute.xlu0 %865  ;;  %v1919_v2 = vpop.permute.xlu1 %870 }
  0xe7   : > { %v1921_v3 = vpop.permute.xlu0 %875  ;;  %v1923_v4 = vpop.permute.xlu1 %880 }
  0xeb   : > { %v934_v5 = vpop.permute.xlu0 %933  ;;  %v939_v6 = vpop.permute.xlu1 %938 }
  0xef   : > { %v944_v7 = vpop.permute.xlu0 %943  ;;  %v949_v8 = vpop.permute.xlu1 %948 }
  0xf3   : > { %v1925_v9 = vpop.permute.xlu0 %953  ;;  %v1927_v10 = vpop.permute.xlu1 %958 }
  0xf7   : > { %v964_v11 = vpop.permute.xlu0 %963  ;;  %v1929_v12 = vpop.permute.xlu1 %968 }
  0xfb   : > { %v1931_v13 = vpop.permute.xlu0 %973  ;;  %v1933_v14 = vpop.permute.xlu1 %978 }
  0xff   : > { %v1935_v15 = vpop.permute.xlu0 %983  ;;  %v1937_v16 = vpop.permute.xlu1 %988 }
 0x103   : > { %v994_v17 = vpop.permute.xlu0 %993  ;;  %v999_v18 = vpop.permute.xlu1 %998 }
 0x107   : > { %v1004_v19 = vpop.permute.xlu0 %1003  ;;  %v1009_v20 = vpop.permute.xlu1 %1008 }
 0x10b   : > { %v1014_v21 = vpop.permute.xlu0 %1013  ;;  %v1940_v22 = vpop.permute.xlu1 %1018 }
 0x10f   : > { %v1024_v23 = vpop.permute.xlu0 %1023 }
 0x195   : > { %v1393_v24 = vpop.f32.mrb[0].mxu0  ;;  %v1405_v25 = vpop.f32.mrb[0].mxu1 }
 0x196   : > { %v885_v26 = vmul.f32 %v1393_v24, %v776_v47  ;;  %v897_v27 = vmul.f32 %v1405_v25, %v836_v59  ;;  %v644_v28 = vpop.f32.mrb[1].mxu0  ;;  %v692_v29 = vpop.f32.mrb[1].mxu1 }
 0x197   : > { %v883_v30 = vmul.f32 %v766_v45, %v644_v28  ;;  %v895_v31 = vmul.f32 %v826_v57, %v692_v29  ;;  %v1394_v32 = vpop.f32.mrb[2].mxu0  ;;  %v1406_v33 = vpop.f32.mrb[2].mxu1 }
 0x198   : > { %v1053_v34 = vadd.f32 %v944_v7, %v885_v26  ;;  %v1065_v35 = vadd.f32 %v1004_v19, %v897_v27  ;;  %v886_v36 = vmul.f32 %v1394_v32, %v781_v48  ;;  %v898_v37 = vmul.f32 %v1406_v33, %v841_v60  ;;  %v647_v38 = vpop.f32.mrb[3].mxu0  ;;  %v695_v39 = vpop.f32.mrb[3].mxu1 }
 0x199   : > { %v1051_v40 = vadd.f32 %v934_v5, %v883_v30  ;;  %v1063_v41 = vadd.f32 %v994_v17, %v895_v31  ;;  %v884_v42 = vmul.f32 %v771_v46, %v647_v38  ;;  %v896_v43 = vmul.f32 %v831_v58, %v695_v39  ;;  %v1029_v46 = vpop.permute.xlu1 %1028  ;;  %v1034_v57 = vpop.permute.xlu0 %1033 }
 0x19a   : > { %1077 = vst [vmem:[%s1942_s22 + $0x10] sm:$0xff] %v1053_v34  ;;  %1089 = vst [vmem:[%s1942_s22 + $0x70] sm:$0xff] %v1065_v35  ;;  %v1054_v44 = vadd.f32 %v949_v8, %v886_v36  ;;  %v1066_v45 = vadd.f32 %v1009_v20, %v898_v37 }
 0x19b   : > { %1075 = vst [vmem:[%s1942_s22] sm:$0xff] %v1051_v40  ;;  %1087 = vst [vmem:[%s1942_s22 + $0x60] sm:$0xff] %v1063_v41  ;;  %v1052_v47 = vadd.f32 %v939_v6, %v884_v42  ;;  %v1064_v48 = vadd.f32 %v999_v18, %v896_v43 }
 0x19c   : > { %1078 = vst [vmem:[%s1942_s22 + $0x18] sm:$0xff] %v1054_v44  ;;  %1090 = vst [vmem:[%s1942_s22 + $0x78] sm:$0xff] %v1066_v45 }
 0x19d   : > { %1076 = vst [vmem:[%s1942_s22 + $0x8] sm:$0xff] %v1052_v47  ;;  %1088 = vst [vmem:[%s1942_s22 + $0x68] sm:$0xff] %v1064_v48  ;;  %v1397_v58 = vpop.f32.mrb[4].mxu0  ;;  %v1409_v59 = vpop.f32.mrb[4].mxu1 }
 0x19e   : > { %v889_v60 = vmul.f32 %v1397_v58, %v1897_v51  ;;  %v901_v5 = vmul.f32 %v1409_v59, %v1913_v63  ;;  %v660_v7 = vpop.f32.mrb[5].mxu0  ;;  %v708_v8 = vpop.f32.mrb[5].mxu1 }
 0x19f   : > { %v887_v17 = vmul.f32 %v1893_v49, %v660_v7  ;;  %v899_v6 = vmul.f32 %v1909_v61, %v708_v8  ;;  %v1398_v18 = vpop.f32.mrb[6].mxu0  ;;  %v1410_v19 = vpop.f32.mrb[6].mxu1 }
 0x1a0   : > { %v1057_v20 = vadd.f32 %v964_v11, %v889_v60  ;;  %v1069_v24 = vadd.f32 %v1024_v23, %v901_v5  ;;  %v890_v25 = vmul.f32 %v1398_v18, %v1899_v52  ;;  %v902_v51 = vmul.f32 %v1410_v19, %v1915_v0  ;;  %v663_v26 = vpop.f32.mrb[7].mxu0  ;;  %v711_v63 = vpop.f32.mrb[7].mxu1 }
 0x1a1   : > { %v1055_v27 = vadd.f32 %v1925_v9, %v887_v17  ;;  %v1067_v49 = vadd.f32 %v1014_v21, %v899_v6  ;;  %v888_v61 = vmul.f32 %v1895_v50, %v663_v26  ;;  %v900_v28 = vmul.f32 %v1911_v62, %v711_v63  ;;  %v1039_v23 = vpop.permute.xlu1 %1038  ;;  %v1044_v9 = vpop.permute.xlu0 %1043  ;;  %v1211_v59 = vld [vmem:[%s1942_s22 + $0x70] sm:$0xff] (%p1643_p6) }
 0x1a2   : > { %1081 = vst [vmem:[%s1942_s22 + $0x30] sm:$0xff] %v1057_v20  ;;  %1093 = vst [vmem:[%s1942_s22 + $0x90] sm:$0xff] %v1069_v24  ;;  %v1058_v11 = vadd.f32 %v1929_v12, %v890_v25  ;;  %v1070_v52 = vadd.f32 %v1029_v46, %v902_v51 }
 0x1a3   : > { %1079 = vst [vmem:[%s1942_s22 + $0x20] sm:$0xff] %v1055_v27  ;;  %1091 = vst [vmem:[%s1942_s22 + $0x80] sm:$0xff] %v1067_v49  ;;  %v1056_v0 = vadd.f32 %v1927_v10, %v888_v61  ;;  %v1068_v29 = vadd.f32 %v1940_v22, %v900_v28  ;;  %v1213_v60 = vld [vmem:[%s1942_s22 + $0x78] sm:$0xff] (%p1643_p6) }
 0x1a4   : > { %1082 = vst [vmem:[%s1942_s22 + $0x38] sm:$0xff] %v1058_v11  ;;  %1094 = vst [vmem:[%s1942_s22 + $0x98] sm:$0xff] %v1070_v52  ;;  %v1209_v58 = vld [vmem:[%s1942_s22 + $0x68] sm:$0xff] (%p1643_p6) }
 0x1a5   : > { %1080 = vst [vmem:[%s1942_s22 + $0x28] sm:$0xff] %v1056_v0  ;;  %1092 = vst [vmem:[%s1942_s22 + $0x88] sm:$0xff] %v1068_v29  ;;  %v1401_v50 = vpop.f32.mrb[8].mxu0  ;;  %v1413_v21 = vpop.f32.mrb[8].mxu1 }
 0x1a6   : > { %v893_v62 = vmul.f32 %v1401_v50, %v1905_v55  ;;  %v905_v30 = vmul.f32 %v1413_v21, %v1921_v3  ;;  %v676_v12 = vpop.f32.mrb[9].mxu0  ;;  %v724_v31 = vpop.f32.mrb[9].mxu1  ;;  %1210 = vst [vmem:[%s2011_s27 + $0x2d8] sm:$0xff] (%p1643_p6), %v1209_v58  ;;  %1212 = vst [vmem:[%s2011_s27 + $0x310] sm:$0xff] (%p1643_p6), %v1211_v59 }
 0x1a7   : > { %v891_v32 = vmul.f32 %v1901_v53, %v676_v12  ;;  %v903_v10 = vmul.f32 %v1917_v1, %v724_v31  ;;  %v1402_v22 = vpop.f32.mrb[10].mxu0  ;;  %v1414_v33 = vpop.f32.mrb[10].mxu1  ;;  %1105 = sbr.rel (!%p1643_p6) target bundleno = 441 (0x1b9), region = 131  ;;  %1214 = vst [vmem:[%s2011_s27 + $0x348] sm:$0xff] (%p1643_p6), %v1213_v60 }
 0x1a8   : > { %v1061_v34 = vadd.f32 %v1935_v15, %v893_v62  ;;  %v1073_v35 = vadd.f32 %v1044_v9, %v905_v30  ;;  %v894_v36 = vmul.f32 %v1402_v22, %v1907_v56  ;;  %v906_v55 = vmul.f32 %v1414_v33, %v1923_v4  ;;  %v679_v3 = vpop.f32.mrb[11].mxu0  ;;  %v727_v37 = vpop.f32.mrb[11].mxu1 }
 0x1a9   : > { %v1049_v53 = vpop.permute.xlu1 %1048  ;;  %v1059_v1 = vadd.f32 %v1931_v13, %v891_v32  ;;  %v1071_v38 = vadd.f32 %v1034_v57, %v903_v10  ;;  %v892_v39 = vmul.f32 %v1903_v54, %v679_v3  ;;  %v904_v15 = vmul.f32 %v1919_v2, %v727_v37  ;;  %v1183_v54 = vld [vmem:[%s1942_s22] sm:$0xff] (%p1643_p6)  ;;  %v1185_v2 = vld [vmem:[%s1942_s22 + $0x8] sm:$0xff] (%p1643_p6)  ;;  %v1187_v13 = vld [vmem:[%s1942_s22 + $0x10] sm:$0xff] (%p1643_p6) }
 0x1aa   : > { %1085 = vst [vmem:[%s1942_s22 + $0x50] sm:$0xff] %v1061_v34  ;;  %1097 = vst [vmem:[%s1942_s22 + $0xb0] sm:$0xff] %v1073_v35  ;;  %v1062_v56 = vadd.f32 %v1937_v16, %v894_v36  ;;  %v1074_v40 = vadd.f32 %v1049_v53, %v906_v55  ;;  %v1191_v16 = vld [vmem:[%s1942_s22 + $0x20] sm:$0xff] (%p1643_p6)  ;;  %v1195_v43 = vld [vmem:[%s1942_s22 + $0x30] sm:$0xff] (%p1643_p6) }
 0x1ab   : > { %1083 = vst [vmem:[%s1942_s22 + $0x40] sm:$0xff] %v1059_v1  ;;  %1095 = vst [vmem:[%s1942_s22 + $0xa0] sm:$0xff] %v1071_v38  ;;  %v1060_v4 = vadd.f32 %v1933_v14, %v892_v39  ;;  %v1072_v41 = vadd.f32 %v1039_v23, %v904_v15  ;;  %v1189_v14 = vld [vmem:[%s1942_s22 + $0x18] sm:$0xff] (%p1643_p6)  ;;  %v1207_v57 = vld [vmem:[%s1942_s22 + $0x60] sm:$0xff] (%p1643_p6) }
 0x1ac   : > { %1086 = vst [vmem:[%s1942_s22 + $0x58] sm:$0xff] %v1062_v56  ;;  %1098 = vst [vmem:[%s1942_s22 + $0xb8] sm:$0xff] %v1074_v40  ;;  %v1193_v42 = vld [vmem:[%s1942_s22 + $0x28] sm:$0xff] (%p1643_p6)  ;;  %v1197_v44 = vld [vmem:[%s1942_s22 + $0x38] sm:$0xff] (%p1643_p6) }
 0x1ad   : > { %1084 = vst [vmem:[%s1942_s22 + $0x48] sm:$0xff] %v1060_v4  ;;  %1096 = vst [vmem:[%s1942_s22 + $0xa8] sm:$0xff] %v1072_v41  ;;  %v1215_v5 = vld [vmem:[%s1942_s22 + $0x80] sm:$0xff] (%p1643_p6)  ;;  %v1217_v7 = vld [vmem:[%s1942_s22 + $0x88] sm:$0xff] (%p1643_p6) }
 0x1ae   : > { %1184 = vst [vmem:[%s2011_s27] sm:$0xff] %v1183_v54  ;;  %1186 = vst [vmem:[%s2011_s27 + $0x38] sm:$0xff] %v1185_v2  ;;  %v1219_v8 = vld [vmem:[%s1942_s22 + $0x90] sm:$0xff]  ;;  %v1221_v17 = vld [vmem:[%s1942_s22 + $0x98] sm:$0xff] }
 0x1af   : > { %1188 = vst [vmem:[%s2011_s27 + $0x70] sm:$0xff] %v1187_v13  ;;  %1190 = vst [vmem:[%s2011_s27 + $0xa8] sm:$0xff] %v1189_v14 }
 0x1b0   : > { %1192 = vst [vmem:[%s2011_s27 + $0xe0] sm:$0xff] %v1191_v16  ;;  %1194 = vst [vmem:[%s2011_s27 + $0x118] sm:$0xff] %v1193_v42 }
 0x1b1   : > { %v1203_v48 = vld [vmem:[%s1942_s22 + $0x50] sm:$0xff]  ;;  %1196 = vst [vmem:[%s2011_s27 + $0x150] sm:$0xff] %v1195_v43  ;;  %1198 = vst [vmem:[%s2011_s27 + $0x188] sm:$0xff] %v1197_v44 }
 0x1b2   : > { %v1199_v45 = vld [vmem:[%s1942_s22 + $0x40] sm:$0xff]  ;;  %1204 = vst [vmem:[%s2011_s27 + $0x230] sm:$0xff] %v1203_v48  ;;  %1208 = vst [vmem:[%s2011_s27 + $0x2a0] sm:$0xff] %v1207_v57  ;;  %v1227_v19 = vld [vmem:[%s1942_s22 + $0xb0] sm:$0xff] }
 0x1b3   : > { %v1205_v46 = vld [vmem:[%s1942_s22 + $0x58] sm:$0xff]  ;;  %1200 = vst [vmem:[%s2011_s27 + $0x1c0] sm:$0xff] %v1199_v45  ;;  %1216 = vst [vmem:[%s2011_s27 + $0x380] sm:$0xff] %v1215_v5  ;;  %v1223_v6 = vld [vmem:[%s1942_s22 + $0xa0] sm:$0xff] }
 0x1b4   : > { %v1201_v47 = vld [vmem:[%s1942_s22 + $0x48] sm:$0xff]  ;;  %1206 = vst [vmem:[%s2011_s27 + $0x268] sm:$0xff] %v1205_v46  ;;  %1218 = vst [vmem:[%s2011_s27 + $0x3b8] sm:$0xff] %v1217_v7  ;;  %v1229_v20 = vld [vmem:[%s1942_s22 + $0xb8] sm:$0xff] }
 0x1b5   : > { %1202 = vst [vmem:[%s2011_s27 + $0x1f8] sm:$0xff] %v1201_v47  ;;  %1220 = vst [vmem:[%s2011_s27 + $0x3f0] sm:$0xff] %v1219_v8  ;;  %v1225_v18 = vld [vmem:[%s1942_s22 + $0xa8] sm:$0xff] }
 0x1b6   : > { %1222 = vst [vmem:[%s2011_s27 + $0x428] sm:$0xff] %v1221_v17  ;;  %1224 = vst [vmem:[%s2011_s27 + $0x460] sm:$0xff] %v1223_v6 }
 0x1b7   : > { %1226 = vst [vmem:[%s2011_s27 + $0x498] sm:$0xff] %v1225_v18  ;;  %1228 = vst [vmem:[%s2011_s27 + $0x4d0] sm:$0xff] %v1227_v19 }
 0x1b8   : > { %1230 = vst [vmem:[%s2011_s27 + $0x508] sm:$0xff] %v1229_v20 }
 0x1b9 PF: > { %s17_s30 = sadd.s32 1, %s1548_s30   ;;  %s2080_s24 = smov %s1528_s25 }
 0x1ba   : > { %p14_p12 = scmp.ge.s32.totalorder %s17_s30, 16   ;;  %s2081_s25 = smov %s1651_s17 }
 0x1bb   : > { %s2082_s26 = smov %s1540_s28  ;;  %s2083_s27 = smov %s1544_s29 }
 0x1bc   : > { %s2084_s28 = smov %s2087_s8  ;;  %s2085_s29 = smov %s2091_s9 }
 0x1bd   :  { %16 = sbr.rel (!%p14_p12) target bundleno = 4 (0x4), region = 208 }

</bundles_post_ra>
